<compile_context>
chip_gen: v6e
topology: v6e:2x2x1
jax: 0.10.0
libtpu: 0.0.40
codegen_flags: <defaults>
</compile_context>

<pallas_src>
from functools import partial

import jax
import jax.numpy as jnp
import numpy as np
from jax.experimental import pallas as pl
from jax.experimental.pallas import tpu as pltpu

# ----- hyperparameters (the globals of the original script, kept small) -----
vocab_size = 65
n_emb = 32
block_size = 16
n_head = 4
n_layer = 2
dropout = 0.0
head_size = n_emb // n_head

VOCAB_PAD = 128                      # lane-dense logits, sliced back to 65 outside

# ----- weight-slab layout (all matmul weights, bf16, 128 lanes wide) -----
#   per layer (LAYER_W_ROWS = 7*C rows):
#     rows [0,   C)   : [Wq | Wk | Wv]   in lanes 0:3C   (fused QKV)
#     rows [C,  2C)   : Wproj            in lanes 0:C
#     rows [2C, 3C)   : W1               in lanes 0:4C
#     rows [3C, 7C)   : W2               in lanes 0:C
#   rows [L*7C, L*7C + C) : lm_head W    in lanes 0:vocab_size
LAYER_W_ROWS = 7 * n_emb
R_LMW = n_layer * LAYER_W_ROWS
WROWS = R_LMW + n_emb                # 480 rows x 128 lanes (bf16)


# --------------------------- shared math helpers ----------------------------
def _layernorm(x, g, b, eps=1e-5):
    mu = jnp.mean(x, axis=-1, keepdims=True)
    var = jnp.mean((x - mu) ** 2, axis=-1, keepdims=True)
    return (x - mu) * jax.lax.rsqrt(var + eps) * g + b


# ------------------------------ fused Pallas kernel ---------------------------
def nanogpt_fused_kernel(x_ref, wmat_ref, aux_ref, o_ref, *,
                         seq_len, r_hm, r_ss, r_vec, r_lmb):
    # x_ref   : (T, C) f32 residual stream of ONE batch element (grid over B)
    # wmat_ref: (WROWS, 128) bf16 — all matmul weights + lm_head
    # aux_ref : (AROWS, 128) f32  — masks, LN params, biases, lm_head bias
    # o_ref   : (T, VOCAB_PAD) f32 lane-dense logits
    T = seq_len
    C = n_emb
    H = n_head
    E = H * T                                   # expanded (head, time) rows
    scale = float(C) ** 0.5                     # NOTE: multiply by n_emb**0.5 (reference)
    bf16 = jnp.bfloat16

    x = x_ref[...]                                            # (T, C) f32

    # host-precomputed constants (one DMA; no iota/select prologue in-kernel)
    attn_bias = aux_ref[0:T, :][:, :E]                        # (T, E) 0 / -1e30 causal
    head_mask = aux_ref[r_hm:r_hm + E, :][:, :C]              # (E, C) 0/1 per-head channels
    seg_sum = aux_ref[r_ss:r_ss + E, :][:, :E]                # (E, E) per-head column sums
    lm_b = aux_ref[r_lmb:r_lmb + 8, :][0:1, :]                # (1, 128)

    for l in range(n_layer):                                  # static, fully unrolled
        wb = l * LAYER_W_ROWS
        vl = aux_ref[r_vec + 8 * l: r_vec + 8 * (l + 1), :]   # (8, 128)
        ln1g, ln1b = vl[0:1, :C], vl[1:2, :C]
        ln2g, ln2b = vl[2:3, :C], vl[3:4, :C]
        bproj, b2 = vl[4:5, :C], vl[5:6, :C]
        b1 = vl[6:7, :]                                       # (1, 4C = 128)

        wqkv = wmat_ref[wb:wb + C, :]                         # (C, 128) bf16 [Wq|Wk|Wv]
        wproj = wmat_ref[wb + C:wb + 2 * C, :]                # (C, 128) bf16, lanes 0:C
        w1 = wmat_ref[wb + 2 * C:wb + 3 * C, :]               # (C, 128) bf16
        w2 = wmat_ref[wb + 3 * C:wb + 7 * C, :]               # (4C, 128) bf16, lanes 0:C

        # --- self-attention branch: x + proj(multi_head_attn(ln1(x))) ---
        h = _layernorm(x, ln1g, ln1b)                         # f32 elementwise
        qkv = jnp.dot(h.astype(bf16), wqkv,
                      preferred_element_type=jnp.float32)     # (T, 128) fused QKV
        q = qkv[:, 0:C]
        k = qkv[:, C:2 * C]
        v = qkv[:, 2 * C:3 * C]

        # stack heads along sublanes; zero out other heads' channels
        k_exp = (jnp.concatenate([k] * H, axis=0) * head_mask).astype(bf16)   # (E, C)
        v_exp = (jnp.concatenate([v] * H, axis=0) * head_mask).astype(bf16)   # (E, C)

        # all-head score matrix (T, E); additive causal mask; segmented softmax
        s = jnp.einsum("tc,ec->te", q.astype(bf16), k_exp,
                       preferred_element_type=jnp.float32) * scale + attn_bias
        s = s - jnp.max(s, axis=-1, keepdims=True)            # shift-invariant, f32
        p = jnp.exp(s)                                        # masked cols are exactly 0
        denom = jnp.dot(p, seg_sum, preferred_element_type=jnp.float32)  # per-head row sums
        pn = (p * pl.reciprocal(denom, approx=True)).astype(bf16)
        attn = jnp.dot(pn, v_exp, preferred_element_type=jnp.float32)    # (T, C) heads concat

        proj = jnp.dot(attn.astype(bf16), wproj,
                       preferred_element_type=jnp.float32)    # (T, 128); lanes C: are 0
        x = x + proj[:, :C] + bproj

        # --- feed-forward branch: x + W2(relu(W1(ln2(x)) + b1)) + b2 ---
        h2 = _layernorm(x, ln2g, ln2b)
        ff = jnp.dot(h2.astype(bf16), w1,
                     preferred_element_type=jnp.float32) + b1 # (T, 4C) f32
        ff = jnp.maximum(ff, 0.0)
        out2 = jnp.dot(ff.astype(bf16), w2,
                       preferred_element_type=jnp.float32)    # (T, 128); lanes C: are 0
        x = x + out2[:, :C] + b2

    # lm_head (NOTE: ln_f intentionally NOT applied — matches the reference model).
    lm_w = wmat_ref[R_LMW:R_LMW + C, :]                       # (C, 128) bf16
    o_ref[...] = jnp.dot(x.astype(bf16), lm_w,
                         preferred_element_type=jnp.float32) + lm_b


# ----------------------- host-side packing of parameters ----------------------
def pack_params(params):
    """Pack all matmul weights into one bf16 slab + LN/bias vectors (f32)."""
    C = n_emb
    wmat = np.zeros((WROWS, 128), np.float32)
    vecs = np.zeros((n_layer, 8, 128), np.float32)
    for l, p in enumerate(params["blocks"]):
        (ln1g, ln1b, wq, wk, wv, wp, bp, ln2g, ln2b, w1, b1, w2, b2) = p
        base = l * LAYER_W_ROWS
        wmat[base:base + C, 0:3 * C] = np.concatenate(
            [np.asarray(wq), np.asarray(wk), np.asarray(wv)], axis=1)
        wmat[base + C:base + 2 * C, 0:C] = np.asarray(wp)
        wmat[base + 2 * C:base + 3 * C, 0:4 * C] = np.asarray(w1)
        wmat[base + 3 * C:base + 7 * C, 0:C] = np.asarray(w2)
        vecs[l, 0, :C] = np.asarray(ln1g)
        vecs[l, 1, :C] = np.asarray(ln1b)
        vecs[l, 2, :C] = np.asarray(ln2g)
        vecs[l, 3, :C] = np.asarray(ln2b)
        vecs[l, 4, :C] = np.asarray(bp)
        vecs[l, 5, :C] = np.asarray(b2)
        vecs[l, 6, :4 * C] = np.asarray(b1)
    wmat[R_LMW:R_LMW + C, 0:vocab_size] = np.asarray(params["lm_w"])
    lm_b_pad = np.zeros((1, 128), np.float32)
    lm_b_pad[0, :vocab_size] = np.asarray(params["lm_b"])
    return dict(wmat=jnp.asarray(wmat, dtype=jnp.bfloat16),
                vecs=jnp.asarray(vecs),
                lm_b_pad=jnp.asarray(lm_b_pad))


def build_aux(vecs, lm_b_pad, T):
    """One f32 slab: [additive causal mask | head mask | seg-sum | per-layer vecs | lm_b]."""
    C, H, HS = n_emb, n_head, head_size
    E = H * T
    r8 = lambda n: ((n + 7) // 8) * 8

    i = np.arange(T)[:, None]
    j = np.arange(E)[None, :]
    attn_bias = np.where((j % T) <= i, 0.0, -1e30).astype(np.float32)          # (T, E)
    e = np.arange(E)
    head_mask = (e[:, None] // T == np.arange(C)[None, :] // HS).astype(np.float32)  # (E, C)
    seg_sum = (e[:, None] // T == e[None, :] // T).astype(np.float32)          # (E, E)

    def pad128(a, rows):
        out = np.zeros((rows, 128), np.float32)
        out[:a.shape[0], :a.shape[1]] = a
        return out

    r_hm = r8(T)
    r_ss = r_hm + r8(E)
    r_vec = r_ss + r8(E)
    r_lmb = r_vec + 8 * n_layer
    aux = np.concatenate([
        pad128(attn_bias, r8(T)),
        pad128(head_mask, r8(E)),
        pad128(seg_sum, r8(E)),
        np.asarray(vecs, np.float32).reshape(8 * n_layer, 128),
        pad128(np.asarray(lm_b_pad, np.float32), 8),
    ], axis=0)
    return jnp.asarray(aux), dict(r_hm=r_hm, r_ss=r_ss, r_vec=r_vec, r_lmb=r_lmb)


# ------------------------------ kernel wrapper --------------------------------
def nanogpt_forward(idx, params, packed):
    B, T = idx.shape
    C = n_emb
    tok_emb = params["tok_emb"][idx]               # (B, T, C) gather (glue in JAX)
    pos_emb = params["pos_emb"][:T]                # (T, C)
    x0 = (tok_emb + pos_emb).astype(jnp.float32)   # (B, T, C)

    aux, offs = build_aux(packed["vecs"], packed["lm_b_pad"], T)
    wmat = packed["wmat"]

    out = pl.pallas_call(
        partial(nanogpt_fused_kernel, seq_len=T, **offs),
        out_shape=jax.ShapeDtypeStruct((B, T, VOCAB_PAD), jnp.float32),
        grid=(B,),
        in_specs=[
            pl.BlockSpec((None, T, C), lambda b: (b, 0, 0)),        # per-batch residual
            pl.BlockSpec(wmat.shape, lambda b: (0, 0)),             # whole weight slab
            pl.BlockSpec(aux.shape, lambda b: (0, 0)),              # whole aux slab
        ],
        out_specs=pl.BlockSpec((None, T, VOCAB_PAD), lambda b: (b, 0, 0)),
        compiler_params=pltpu.CompilerParams(dimension_semantics=("parallel",)),
    )(x0, wmat, aux)

    logits = out[:, :, :vocab_size]
    return logits, None                            # (logits, loss) with targets=None


# -------------------------- pure-JAX reference check -------------------------
def reference_forward(idx, params):
    B, T = idx.shape
    x = (params["tok_emb"][idx] + params["pos_emb"][:T]).astype(jnp.float32)
    mask = jnp.tril(jnp.ones((T, T), dtype=bool))
    scale = n_emb ** 0.5
    for p in params["blocks"]:
        (ln1g, ln1b, wq, wk, wv, wp, bp, ln2g, ln2b, w1, b1, w2, b2) = p
        h = _layernorm(x, ln1g, ln1b)
        q, k, v = h @ wq, h @ wk, h @ wv
        outs = []
        for hd in range(n_head):
            s0 = hd * head_size
            qh, kh, vh = (q[..., s0:s0 + head_size], k[..., s0:s0 + head_size],
                          v[..., s0:s0 + head_size])
            wei = jnp.einsum("btd,bsd->bts", qh, kh) * scale
            wei = jnp.where(mask, wei, -jnp.inf)
            wei = jax.nn.softmax(wei, axis=-1)
            outs.append(jnp.einsum("bts,bsd->btd", wei, vh))
        x = x + jnp.concatenate(outs, -1) @ wp + bp
        h2 = _layernorm(x, ln2g, ln2b)
        x = x + jnp.maximum(h2 @ w1 + b1, 0.0) @ w2 + b2
    return x @ params["lm_w"] + params["lm_b"]


# ------------------------------ parameter init --------------------------------
def init_params(key):
    def normal(k, shape, scale=0.02):
        return (scale * jax.random.normal(k, shape)).astype(jnp.float32)

    keys = iter(jax.random.split(key, 16 + 16 * n_layer))
    params = {
        "tok_emb": normal(next(keys), (vocab_size, n_emb)),
        "pos_emb": normal(next(keys), (block_size, n_emb)),
        "lm_w": normal(next(keys), (n_emb, vocab_size)),
        "lm_b": normal(next(keys), (vocab_size,)),
        "blocks": [],
    }
    for _ in range(n_layer):
        p = (
            1.0 + normal(next(keys), (n_emb,), 0.1),       # ln1 gamma
            normal(next(keys), (n_emb,), 0.1),             # ln1 beta
            normal(next(keys), (n_emb, n_emb)),            # Wq (heads concat)
            normal(next(keys), (n_emb, n_emb)),            # Wk
            normal(next(keys), (n_emb, n_emb)),            # Wv
            normal(next(keys), (n_emb, n_emb)),            # Wproj
            normal(next(keys), (n_emb,)),                  # bproj
            1.0 + normal(next(keys), (n_emb,), 0.1),       # ln2 gamma
            normal(next(keys), (n_emb,), 0.1),             # ln2 beta
            normal(next(keys), (n_emb, 4 * n_emb)),        # W1
            normal(next(keys), (4 * n_emb,)),              # b1
            normal(next(keys), (4 * n_emb, n_emb)),        # W2
            normal(next(keys), (n_emb,)),                  # b2
        )
        params["blocks"].append(p)
    return params


# ------------------------------------ main ------------------------------------
if __name__ == "__main__":
    key = jax.random.PRNGKey(0)
    pkey, ikey = jax.random.split(key)
    params = init_params(pkey)
    packed = pack_params(params)

    B, T = 2, 8                                   # T <= block_size
    idx = jax.random.randint(ikey, (B, T), 0, vocab_size, dtype=jnp.int32)

    logits, loss = nanogpt_forward(idx, params, packed)
    logits = jax.block_until_ready(logits)
    assert logits.shape == (B, T, vocab_size)
    assert loss is None

    ref = jax.block_until_ready(reference_forward(idx, params))
    np.testing.assert_allclose(np.asarray(logits), np.asarray(ref),
                               rtol=2e-2, atol=2e-2)
    print("KERNEL_OK")
</pallas_src>

<mosaic_0001>
module attributes {stable_mosaic.version = 11 : i64} {
  func.func @nanogpt_fused_kernel(%arg0: i32, %arg1: memref<1x8x32xf32, #tpu.memory_space<vmem>>, %arg2: memref<480x128xbf16, #tpu.memory_space<vmem>>, %arg3: memref<96x128xf32, #tpu.memory_space<vmem>>, %arg4: memref<1x8x128xf32, #tpu.memory_space<vmem>>) attributes {dimension_semantics = [#tpu.dimension_semantics<parallel>], iteration_bounds = array<i64: 2>, scalar_prefetch = 0 : i64, scratch_operands = 0 : i64, tpu.core_type = #tpu.core_type<tc>, window_params = [{transform_indices = @transform_0, window_bounds = array<i64: 1, 8, 32>}, {pipeline_mode = #tpu.pipeline_mode<synchronous>, transform_indices = @transform_1, window_bounds = array<i64: 480, 128>}, {pipeline_mode = #tpu.pipeline_mode<synchronous>, transform_indices = @transform_2, window_bounds = array<i64: 96, 128>}, {transform_indices = @transform_3, window_bounds = array<i64: 1, 8, 128>}]} {
    %c0 = arith.constant 0 : index
    %c0_0 = arith.constant 0 : index
    %c0_1 = arith.constant 0 : index
    %0 = vector.load %arg1[%c0, %c0_0, %c0_1] : memref<1x8x32xf32, #tpu.memory_space<vmem>>, vector<1x8x32xf32>
    %1 = vector.shape_cast %0 : vector<1x8x32xf32> to vector<8x32xf32>
    %c0_2 = arith.constant 0 : index
    %c0_3 = arith.constant 0 : index
    %2 = vector.load %arg3[%c0_2, %c0_3] : memref<96x128xf32, #tpu.memory_space<vmem>>, vector<8x128xf32>
    %3 = vector.extract_strided_slice %2 {offsets = [0, 0], sizes = [8, 32], strides = [1, 1]} : vector<8x128xf32> to vector<8x32xf32>
    %c8 = arith.constant 8 : index
    %c0_4 = arith.constant 0 : index
    %4 = vector.load %arg3[%c8, %c0_4] : memref<96x128xf32, #tpu.memory_space<vmem>>, vector<32x128xf32>
    %5 = vector.extract_strided_slice %4 {offsets = [0, 0], sizes = [32, 32], strides = [1, 1]} : vector<32x128xf32> to vector<32x32xf32>
    %c40 = arith.constant 40 : index
    %c0_5 = arith.constant 0 : index
    %6 = vector.load %arg3[%c40, %c0_5] : memref<96x128xf32, #tpu.memory_space<vmem>>, vector<32x128xf32>
    %7 = vector.extract_strided_slice %6 {offsets = [0, 0], sizes = [32, 32], strides = [1, 1]} : vector<32x128xf32> to vector<32x32xf32>
    %c88 = arith.constant 88 : index
    %c0_6 = arith.constant 0 : index
    %8 = vector.load %arg3[%c88, %c0_6] : memref<96x128xf32, #tpu.memory_space<vmem>>, vector<8x128xf32>
    %9 = vector.extract_strided_slice %8 {offsets = [0, 0], sizes = [1, 128], strides = [1, 1]} : vector<8x128xf32> to vector<1x128xf32>
    %c72 = arith.constant 72 : index
    %c0_7 = arith.constant 0 : index
    %10 = vector.load %arg3[%c72, %c0_7] : memref<96x128xf32, #tpu.memory_space<vmem>>, vector<8x128xf32>
    %11 = vector.extract_strided_slice %10 {offsets = [0, 0], sizes = [1, 32], strides = [1, 1]} : vector<8x128xf32> to vector<1x32xf32>
    %12 = vector.extract_strided_slice %10 {offsets = [1, 0], sizes = [1, 32], strides = [1, 1]} : vector<8x128xf32> to vector<1x32xf32>
    %13 = vector.extract_strided_slice %10 {offsets = [2, 0], sizes = [1, 32], strides = [1, 1]} : vector<8x128xf32> to vector<1x32xf32>
    %14 = vector.extract_strided_slice %10 {offsets = [3, 0], sizes = [1, 32], strides = [1, 1]} : vector<8x128xf32> to vector<1x32xf32>
    %15 = vector.extract_strided_slice %10 {offsets = [4, 0], sizes = [1, 32], strides = [1, 1]} : vector<8x128xf32> to vector<1x32xf32>
    %16 = vector.extract_strided_slice %10 {offsets = [5, 0], sizes = [1, 32], strides = [1, 1]} : vector<8x128xf32> to vector<1x32xf32>
    %17 = vector.extract_strided_slice %10 {offsets = [6, 0], sizes = [1, 128], strides = [1, 1]} : vector<8x128xf32> to vector<1x128xf32>
    %c0_8 = arith.constant 0 : index
    %c0_9 = arith.constant 0 : index
    %18 = vector.load %arg2[%c0_8, %c0_9] : memref<480x128xbf16, #tpu.memory_space<vmem>>, vector<32x128xbf16>
    %c32 = arith.constant 32 : index
    %c0_10 = arith.constant 0 : index
    %19 = vector.load %arg2[%c32, %c0_10] : memref<480x128xbf16, #tpu.memory_space<vmem>>, vector<32x128xbf16>
    %c64 = arith.constant 64 : index
    %c0_11 = arith.constant 0 : index
    %20 = vector.load %arg2[%c64, %c0_11] : memref<480x128xbf16, #tpu.memory_space<vmem>>, vector<32x128xbf16>
    %c96 = arith.constant 96 : index
    %c0_12 = arith.constant 0 : index
    %21 = vector.load %arg2[%c96, %c0_12] : memref<480x128xbf16, #tpu.memory_space<vmem>>, vector<128x128xbf16>
    %cst = arith.constant dense<0.000000e+00> : vector<8xf32>
    %22 = vector.multi_reduction <add>, %1, %cst [1] : vector<8x32xf32> to vector<8xf32>
    %23 = vector.shape_cast %22 : vector<8xf32> to vector<8x1xf32>
    %cst_13 = arith.constant 3.200000e+01 : f32
    %24 = vector.broadcast %cst_13 : f32 to vector<8x1xf32>
    %25 = arith.divf %23, %24 : vector<8x1xf32>
    %26 = vector.broadcast %25 : vector<8x1xf32> to vector<8x32xf32>
    %27 = arith.subf %1, %26 : vector<8x32xf32>
    %28 = arith.mulf %27, %27 : vector<8x32xf32>
    %cst_14 = arith.constant dense<0.000000e+00> : vector<8xf32>
    %29 = vector.multi_reduction <add>, %28, %cst_14 [1] : vector<8x32xf32> to vector<8xf32>
    %30 = vector.shape_cast %29 : vector<8xf32> to vector<8x1xf32>
    %cst_15 = arith.constant 3.200000e+01 : f32
    %31 = vector.broadcast %cst_15 : f32 to vector<8x1xf32>
    %32 = arith.divf %30, %31 : vector<8x1xf32>
    %33 = vector.broadcast %25 : vector<8x1xf32> to vector<8x32xf32>
    %34 = arith.subf %1, %33 : vector<8x32xf32>
    %cst_16 = arith.constant 9.99999974E-6 : f32
    %35 = vector.broadcast %cst_16 : f32 to vector<8x1xf32>
    %36 = arith.addf %32, %35 : vector<8x1xf32>
    %37 = math.rsqrt %36 : vector<8x1xf32>
    %38 = vector.broadcast %37 : vector<8x1xf32> to vector<8x32xf32>
    %39 = arith.mulf %34, %38 : vector<8x32xf32>
    %40 = vector.broadcast %11 : vector<1x32xf32> to vector<8x32xf32>
    %41 = arith.mulf %39, %40 : vector<8x32xf32>
    %42 = vector.broadcast %12 : vector<1x32xf32> to vector<8x32xf32>
    %43 = arith.addf %41, %42 : vector<8x32xf32>
    %44 = arith.truncf %43 : vector<8x32xf32> to vector<8x32xbf16>
    %cst_17 = arith.constant dense<0.000000e+00> : vector<8x128xf32>
    %45 = tpu.matmul %44, %18, %cst_17 {dimension_numbers = #tpu.dot_dimension_numbers<[1], [0], [0], [1], [0, 0, 1, 1], [], []>} : vector<8x32xbf16>, vector<32x128xbf16>, vector<8x128xf32> -> vector<8x128xf32>
    %46 = vector.extract_strided_slice %45 {offsets = [0, 0], sizes = [8, 32], strides = [1, 1]} : vector<8x128xf32> to vector<8x32xf32>
    %47 = vector.extract_strided_slice %45 {offsets = [0, 32], sizes = [8, 32], strides = [1, 1]} : vector<8x128xf32> to vector<8x32xf32>
    %48 = vector.extract_strided_slice %45 {offsets = [0, 64], sizes = [8, 32], strides = [1, 1]} : vector<8x128xf32> to vector<8x32xf32>
    %49 = tpu.concatenate %47, %47, %47, %47 in 0 : vector<8x32xf32>, vector<8x32xf32>, vector<8x32xf32>, vector<8x32xf32> -> vector<32x32xf32>
    %50 = arith.mulf %49, %5 : vector<32x32xf32>
    %51 = arith.truncf %50 : vector<32x32xf32> to vector<32x32xbf16>
    %52 = tpu.concatenate %48, %48, %48, %48 in 0 : vector<8x32xf32>, vector<8x32xf32>, vector<8x32xf32>, vector<8x32xf32> -> vector<32x32xf32>
    %53 = arith.mulf %52, %5 : vector<32x32xf32>
    %54 = arith.truncf %53 : vector<32x32xf32> to vector<32x32xbf16>
    %55 = arith.truncf %46 : vector<8x32xf32> to vector<8x32xbf16>
    "tpu.trace_start"() <{level = 10 : i32, message = "tc,ec->te"}> : () -> ()
    %cst_18 = arith.constant dense<0.000000e+00> : vector<8x32xf32>
    %56 = tpu.matmul %55, %51, %cst_18 {dimension_numbers = #tpu.dot_dimension_numbers<[1], [1], [0], [0], [0, 0, 1, 0], [], []>} : vector<8x32xbf16>, vector<32x32xbf16>, vector<8x32xf32> -> vector<8x32xf32>
    "tpu.trace_stop"() : () -> ()
    %cst_19 = arith.constant 5.65685415 : f32
    %57 = vector.broadcast %cst_19 : f32 to vector<8x32xf32>
    %58 = arith.mulf %56, %57 : vector<8x32xf32>
    %59 = arith.addf %58, %3 : vector<8x32xf32>
    %cst_20 = arith.constant dense<0xFF800000> : vector<8xf32>
    %60 = vector.multi_reduction <maximumf>, %59, %cst_20 [1] : vector<8x32xf32> to vector<8xf32>
    %61 = vector.shape_cast %60 : vector<8xf32> to vector<8x1xf32>
    %62 = vector.broadcast %61 : vector<8x1xf32> to vector<8x32xf32>
    %63 = arith.subf %59, %62 : vector<8x32xf32>
    %64 = math.exp %63 : vector<8x32xf32>
    %cst_21 = arith.constant dense<0.000000e+00> : vector<8x32xf32>
    %65 = tpu.matmul %64, %7, %cst_21 {dimension_numbers = #tpu.dot_dimension_numbers<[1], [0], [0], [1], [0, 0, 1, 1], [], []>} : vector<8x32xf32>, vector<32x32xf32>, vector<8x32xf32> -> vector<8x32xf32>
    %66 = tpu.reciprocal %65 {approx = true} : vector<8x32xf32> -> vector<8x32xf32>
    %67 = arith.mulf %64, %66 : vector<8x32xf32>
    %68 = arith.truncf %67 : vector<8x32xf32> to vector<8x32xbf16>
    %cst_22 = arith.constant dense<0.000000e+00> : vector<8x32xf32>
    %69 = tpu.matmul %68, %54, %cst_22 {dimension_numbers = #tpu.dot_dimension_numbers<[1], [0], [0], [1], [0, 0, 1, 1], [], []>} : vector<8x32xbf16>, vector<32x32xbf16>, vector<8x32xf32> -> vector<8x32xf32>
    %70 = arith.truncf %69 : vector<8x32xf32> to vector<8x32xbf16>
    %cst_23 = arith.constant dense<0.000000e+00> : vector<8x128xf32>
    %71 = tpu.matmul %70, %19, %cst_23 {dimension_numbers = #tpu.dot_dimension_numbers<[1], [0], [0], [1], [0, 0, 1, 1], [], []>} : vector<8x32xbf16>, vector<32x128xbf16>, vector<8x128xf32> -> vector<8x128xf32>
    %72 = vector.extract_strided_slice %71 {offsets = [0, 0], sizes = [8, 32], strides = [1, 1]} : vector<8x128xf32> to vector<8x32xf32>
    %73 = arith.addf %1, %72 : vector<8x32xf32>
    %74 = vector.broadcast %15 : vector<1x32xf32> to vector<8x32xf32>
    %75 = arith.addf %73, %74 : vector<8x32xf32>
    %cst_24 = arith.constant dense<0.000000e+00> : vector<8xf32>
    %76 = vector.multi_reduction <add>, %75, %cst_24 [1] : vector<8x32xf32> to vector<8xf32>
    %77 = vector.shape_cast %76 : vector<8xf32> to vector<8x1xf32>
    %cst_25 = arith.constant 3.200000e+01 : f32
    %78 = vector.broadcast %cst_25 : f32 to vector<8x1xf32>
    %79 = arith.divf %77, %78 : vector<8x1xf32>
    %80 = vector.broadcast %79 : vector<8x1xf32> to vector<8x32xf32>
    %81 = arith.subf %75, %80 : vector<8x32xf32>
    %82 = arith.mulf %81, %81 : vector<8x32xf32>
    %cst_26 = arith.constant dense<0.000000e+00> : vector<8xf32>
    %83 = vector.multi_reduction <add>, %82, %cst_26 [1] : vector<8x32xf32> to vector<8xf32>
    %84 = vector.shape_cast %83 : vector<8xf32> to vector<8x1xf32>
    %cst_27 = arith.constant 3.200000e+01 : f32
    %85 = vector.broadcast %cst_27 : f32 to vector<8x1xf32>
    %86 = arith.divf %84, %85 : vector<8x1xf32>
    %87 = vector.broadcast %79 : vector<8x1xf32> to vector<8x32xf32>
    %88 = arith.subf %75, %87 : vector<8x32xf32>
    %cst_28 = arith.constant 9.99999974E-6 : f32
    %89 = vector.broadcast %cst_28 : f32 to vector<8x1xf32>
    %90 = arith.addf %86, %89 : vector<8x1xf32>
    %91 = math.rsqrt %90 : vector<8x1xf32>
    %92 = vector.broadcast %91 : vector<8x1xf32> to vector<8x32xf32>
    %93 = arith.mulf %88, %92 : vector<8x32xf32>
    %94 = vector.broadcast %13 : vector<1x32xf32> to vector<8x32xf32>
    %95 = arith.mulf %93, %94 : vector<8x32xf32>
    %96 = vector.broadcast %14 : vector<1x32xf32> to vector<8x32xf32>
    %97 = arith.addf %95, %96 : vector<8x32xf32>
    %98 = arith.truncf %97 : vector<8x32xf32> to vector<8x32xbf16>
    %cst_29 = arith.constant dense<0.000000e+00> : vector<8x128xf32>
    %99 = tpu.matmul %98, %20, %cst_29 {dimension_numbers = #tpu.dot_dimension_numbers<[1], [0], [0], [1], [0, 0, 1, 1], [], []>} : vector<8x32xbf16>, vector<32x128xbf16>, vector<8x128xf32> -> vector<8x128xf32>
    %100 = vector.broadcast %17 : vector<1x128xf32> to vector<8x128xf32>
    %101 = arith.addf %99, %100 : vector<8x128xf32>
    %cst_30 = arith.constant 0.000000e+00 : f32
    %102 = vector.broadcast %cst_30 : f32 to vector<8x128xf32>
    %103 = arith.maximumf %101, %102 : vector<8x128xf32>
    %104 = arith.truncf %103 : vector<8x128xf32> to vector<8x128xbf16>
    %cst_31 = arith.constant dense<0.000000e+00> : vector<8x128xf32>
    %105 = tpu.matmul %104, %21, %cst_31 {dimension_numbers = #tpu.dot_dimension_numbers<[1], [0], [0], [1], [0, 0, 1, 1], [], []>} : vector<8x128xbf16>, vector<128x128xbf16>, vector<8x128xf32> -> vector<8x128xf32>
    %106 = vector.extract_strided_slice %105 {offsets = [0, 0], sizes = [8, 32], strides = [1, 1]} : vector<8x128xf32> to vector<8x32xf32>
    %107 = arith.addf %75, %106 : vector<8x32xf32>
    %108 = vector.broadcast %16 : vector<1x32xf32> to vector<8x32xf32>
    %109 = arith.addf %107, %108 : vector<8x32xf32>
    %c80 = arith.constant 80 : index
    %c0_32 = arith.constant 0 : index
    %110 = vector.load %arg3[%c80, %c0_32] : memref<96x128xf32, #tpu.memory_space<vmem>>, vector<8x128xf32>
    %111 = vector.extract_strided_slice %110 {offsets = [0, 0], sizes = [1, 32], strides = [1, 1]} : vector<8x128xf32> to vector<1x32xf32>
    %112 = vector.extract_strided_slice %110 {offsets = [1, 0], sizes = [1, 32], strides = [1, 1]} : vector<8x128xf32> to vector<1x32xf32>
    %113 = vector.extract_strided_slice %110 {offsets = [2, 0], sizes = [1, 32], strides = [1, 1]} : vector<8x128xf32> to vector<1x32xf32>
    %114 = vector.extract_strided_slice %110 {offsets = [3, 0], sizes = [1, 32], strides = [1, 1]} : vector<8x128xf32> to vector<1x32xf32>
    %115 = vector.extract_strided_slice %110 {offsets = [4, 0], sizes = [1, 32], strides = [1, 1]} : vector<8x128xf32> to vector<1x32xf32>
    %116 = vector.extract_strided_slice %110 {offsets = [5, 0], sizes = [1, 32], strides = [1, 1]} : vector<8x128xf32> to vector<1x32xf32>
    %117 = vector.extract_strided_slice %110 {offsets = [6, 0], sizes = [1, 128], strides = [1, 1]} : vector<8x128xf32> to vector<1x128xf32>
    %c224 = arith.constant 224 : index
    %c0_33 = arith.constant 0 : index
    %118 = vector.load %arg2[%c224, %c0_33] : memref<480x128xbf16, #tpu.memory_space<vmem>>, vector<32x128xbf16>
    %c256 = arith.constant 256 : index
    %c0_34 = arith.constant 0 : index
    %119 = vector.load %arg2[%c256, %c0_34] : memref<480x128xbf16, #tpu.memory_space<vmem>>, vector<32x128xbf16>
    %c288 = arith.constant 288 : index
    %c0_35 = arith.constant 0 : index
    %120 = vector.load %arg2[%c288, %c0_35] : memref<480x128xbf16, #tpu.memory_space<vmem>>, vector<32x128xbf16>
    %c320 = arith.constant 320 : index
    %c0_36 = arith.constant 0 : index
    %121 = vector.load %arg2[%c320, %c0_36] : memref<480x128xbf16, #tpu.memory_space<vmem>>, vector<128x128xbf16>
    %cst_37 = arith.constant dense<0.000000e+00> : vector<8xf32>
    %122 = vector.multi_reduction <add>, %109, %cst_37 [1] : vector<8x32xf32> to vector<8xf32>
    %123 = vector.shape_cast %122 : vector<8xf32> to vector<8x1xf32>
    %cst_38 = arith.constant 3.200000e+01 : f32
    %124 = vector.broadcast %cst_38 : f32 to vector<8x1xf32>
    %125 = arith.divf %123, %124 : vector<8x1xf32>
    %126 = vector.broadcast %125 : vector<8x1xf32> to vector<8x32xf32>
    %127 = arith.subf %109, %126 : vector<8x32xf32>
    %128 = arith.mulf %127, %127 : vector<8x32xf32>
    %cst_39 = arith.constant dense<0.000000e+00> : vector<8xf32>
    %129 = vector.multi_reduction <add>, %128, %cst_39 [1] : vector<8x32xf32> to vector<8xf32>
    %130 = vector.shape_cast %129 : vector<8xf32> to vector<8x1xf32>
    %cst_40 = arith.constant 3.200000e+01 : f32
    %131 = vector.broadcast %cst_40 : f32 to vector<8x1xf32>
    %132 = arith.divf %130, %131 : vector<8x1xf32>
    %133 = vector.broadcast %125 : vector<8x1xf32> to vector<8x32xf32>
    %134 = arith.subf %109, %133 : vector<8x32xf32>
    %cst_41 = arith.constant 9.99999974E-6 : f32
    %135 = vector.broadcast %cst_41 : f32 to vector<8x1xf32>
    %136 = arith.addf %132, %135 : vector<8x1xf32>
    %137 = math.rsqrt %136 : vector<8x1xf32>
    %138 = vector.broadcast %137 : vector<8x1xf32> to vector<8x32xf32>
    %139 = arith.mulf %134, %138 : vector<8x32xf32>
    %140 = vector.broadcast %111 : vector<1x32xf32> to vector<8x32xf32>
    %141 = arith.mulf %139, %140 : vector<8x32xf32>
    %142 = vector.broadcast %112 : vector<1x32xf32> to vector<8x32xf32>
    %143 = arith.addf %141, %142 : vector<8x32xf32>
    %144 = arith.truncf %143 : vector<8x32xf32> to vector<8x32xbf16>
    %cst_42 = arith.constant dense<0.000000e+00> : vector<8x128xf32>
    %145 = tpu.matmul %144, %118, %cst_42 {dimension_numbers = #tpu.dot_dimension_numbers<[1], [0], [0], [1], [0, 0, 1, 1], [], []>} : vector<8x32xbf16>, vector<32x128xbf16>, vector<8x128xf32> -> vector<8x128xf32>
    %146 = vector.extract_strided_slice %145 {offsets = [0, 0], sizes = [8, 32], strides = [1, 1]} : vector<8x128xf32> to vector<8x32xf32>
    %147 = vector.extract_strided_slice %145 {offsets = [0, 32], sizes = [8, 32], strides = [1, 1]} : vector<8x128xf32> to vector<8x32xf32>
    %148 = vector.extract_strided_slice %145 {offsets = [0, 64], sizes = [8, 32], strides = [1, 1]} : vector<8x128xf32> to vector<8x32xf32>
    %149 = tpu.concatenate %147, %147, %147, %147 in 0 : vector<8x32xf32>, vector<8x32xf32>, vector<8x32xf32>, vector<8x32xf32> -> vector<32x32xf32>
    %150 = arith.mulf %149, %5 : vector<32x32xf32>
    %151 = arith.truncf %150 : vector<32x32xf32> to vector<32x32xbf16>
    %152 = tpu.concatenate %148, %148, %148, %148 in 0 : vector<8x32xf32>, vector<8x32xf32>, vector<8x32xf32>, vector<8x32xf32> -> vector<32x32xf32>
    %153 = arith.mulf %152, %5 : vector<32x32xf32>
    %154 = arith.truncf %153 : vector<32x32xf32> to vector<32x32xbf16>
    %155 = arith.truncf %146 : vector<8x32xf32> to vector<8x32xbf16>
    "tpu.trace_start"() <{level = 10 : i32, message = "tc,ec->te"}> : () -> ()
    %cst_43 = arith.constant dense<0.000000e+00> : vector<8x32xf32>
    %156 = tpu.matmul %155, %151, %cst_43 {dimension_numbers = #tpu.dot_dimension_numbers<[1], [1], [0], [0], [0, 0, 1, 0], [], []>} : vector<8x32xbf16>, vector<32x32xbf16>, vector<8x32xf32> -> vector<8x32xf32>
    "tpu.trace_stop"() : () -> ()
    %cst_44 = arith.constant 5.65685415 : f32
    %157 = vector.broadcast %cst_44 : f32 to vector<8x32xf32>
    %158 = arith.mulf %156, %157 : vector<8x32xf32>
    %159 = arith.addf %158, %3 : vector<8x32xf32>
    %cst_45 = arith.constant dense<0xFF800000> : vector<8xf32>
    %160 = vector.multi_reduction <maximumf>, %159, %cst_45 [1] : vector<8x32xf32> to vector<8xf32>
    %161 = vector.shape_cast %160 : vector<8xf32> to vector<8x1xf32>
    %162 = vector.broadcast %161 : vector<8x1xf32> to vector<8x32xf32>
    %163 = arith.subf %159, %162 : vector<8x32xf32>
    %164 = math.exp %163 : vector<8x32xf32>
    %cst_46 = arith.constant dense<0.000000e+00> : vector<8x32xf32>
    %165 = tpu.matmul %164, %7, %cst_46 {dimension_numbers = #tpu.dot_dimension_numbers<[1], [0], [0], [1], [0, 0, 1, 1], [], []>} : vector<8x32xf32>, vector<32x32xf32>, vector<8x32xf32> -> vector<8x32xf32>
    %166 = tpu.reciprocal %165 {approx = true} : vector<8x32xf32> -> vector<8x32xf32>
    %167 = arith.mulf %164, %166 : vector<8x32xf32>
    %168 = arith.truncf %167 : vector<8x32xf32> to vector<8x32xbf16>
    %cst_47 = arith.constant dense<0.000000e+00> : vector<8x32xf32>
    %169 = tpu.matmul %168, %154, %cst_47 {dimension_numbers = #tpu.dot_dimension_numbers<[1], [0], [0], [1], [0, 0, 1, 1], [], []>} : vector<8x32xbf16>, vector<32x32xbf16>, vector<8x32xf32> -> vector<8x32xf32>
    %170 = arith.truncf %169 : vector<8x32xf32> to vector<8x32xbf16>
    %cst_48 = arith.constant dense<0.000000e+00> : vector<8x128xf32>
    %171 = tpu.matmul %170, %119, %cst_48 {dimension_numbers = #tpu.dot_dimension_numbers<[1], [0], [0], [1], [0, 0, 1, 1], [], []>} : vector<8x32xbf16>, vector<32x128xbf16>, vector<8x128xf32> -> vector<8x128xf32>
    %172 = vector.extract_strided_slice %171 {offsets = [0, 0], sizes = [8, 32], strides = [1, 1]} : vector<8x128xf32> to vector<8x32xf32>
    %173 = arith.addf %109, %172 : vector<8x32xf32>
    %174 = vector.broadcast %115 : vector<1x32xf32> to vector<8x32xf32>
    %175 = arith.addf %173, %174 : vector<8x32xf32>
    %cst_49 = arith.constant dense<0.000000e+00> : vector<8xf32>
    %176 = vector.multi_reduction <add>, %175, %cst_49 [1] : vector<8x32xf32> to vector<8xf32>
    %177 = vector.shape_cast %176 : vector<8xf32> to vector<8x1xf32>
    %cst_50 = arith.constant 3.200000e+01 : f32
    %178 = vector.broadcast %cst_50 : f32 to vector<8x1xf32>
    %179 = arith.divf %177, %178 : vector<8x1xf32>
    %180 = vector.broadcast %179 : vector<8x1xf32> to vector<8x32xf32>
    %181 = arith.subf %175, %180 : vector<8x32xf32>
    %182 = arith.mulf %181, %181 : vector<8x32xf32>
    %cst_51 = arith.constant dense<0.000000e+00> : vector<8xf32>
    %183 = vector.multi_reduction <add>, %182, %cst_51 [1] : vector<8x32xf32> to vector<8xf32>
    %184 = vector.shape_cast %183 : vector<8xf32> to vector<8x1xf32>
    %cst_52 = arith.constant 3.200000e+01 : f32
    %185 = vector.broadcast %cst_52 : f32 to vector<8x1xf32>
    %186 = arith.divf %184, %185 : vector<8x1xf32>
    %187 = vector.broadcast %179 : vector<8x1xf32> to vector<8x32xf32>
    %188 = arith.subf %175, %187 : vector<8x32xf32>
    %cst_53 = arith.constant 9.99999974E-6 : f32
    %189 = vector.broadcast %cst_53 : f32 to vector<8x1xf32>
    %190 = arith.addf %186, %189 : vector<8x1xf32>
    %191 = math.rsqrt %190 : vector<8x1xf32>
    %192 = vector.broadcast %191 : vector<8x1xf32> to vector<8x32xf32>
    %193 = arith.mulf %188, %192 : vector<8x32xf32>
    %194 = vector.broadcast %113 : vector<1x32xf32> to vector<8x32xf32>
    %195 = arith.mulf %193, %194 : vector<8x32xf32>
    %196 = vector.broadcast %114 : vector<1x32xf32> to vector<8x32xf32>
    %197 = arith.addf %195, %196 : vector<8x32xf32>
    %198 = arith.truncf %197 : vector<8x32xf32> to vector<8x32xbf16>
    %cst_54 = arith.constant dense<0.000000e+00> : vector<8x128xf32>
    %199 = tpu.matmul %198, %120, %cst_54 {dimension_numbers = #tpu.dot_dimension_numbers<[1], [0], [0], [1], [0, 0, 1, 1], [], []>} : vector<8x32xbf16>, vector<32x128xbf16>, vector<8x128xf32> -> vector<8x128xf32>
    %200 = vector.broadcast %117 : vector<1x128xf32> to vector<8x128xf32>
    %201 = arith.addf %199, %200 : vector<8x128xf32>
    %cst_55 = arith.constant 0.000000e+00 : f32
    %202 = vector.broadcast %cst_55 : f32 to vector<8x128xf32>
    %203 = arith.maximumf %201, %202 : vector<8x128xf32>
    %204 = arith.truncf %203 : vector<8x128xf32> to vector<8x128xbf16>
    %cst_56 = arith.constant dense<0.000000e+00> : vector<8x128xf32>
    %205 = tpu.matmul %204, %121, %cst_56 {dimension_numbers = #tpu.dot_dimension_numbers<[1], [0], [0], [1], [0, 0, 1, 1], [], []>} : vector<8x128xbf16>, vector<128x128xbf16>, vector<8x128xf32> -> vector<8x128xf32>
    %206 = vector.extract_strided_slice %205 {offsets = [0, 0], sizes = [8, 32], strides = [1, 1]} : vector<8x128xf32> to vector<8x32xf32>
    %207 = arith.addf %175, %206 : vector<8x32xf32>
    %208 = vector.broadcast %116 : vector<1x32xf32> to vector<8x32xf32>
    %209 = arith.addf %207, %208 : vector<8x32xf32>
    %c448 = arith.constant 448 : index
    %c0_57 = arith.constant 0 : index
    %210 = vector.load %arg2[%c448, %c0_57] : memref<480x128xbf16, #tpu.memory_space<vmem>>, vector<32x128xbf16>
    %211 = arith.truncf %209 : vector<8x32xf32> to vector<8x32xbf16>
    %cst_58 = arith.constant dense<0.000000e+00> : vector<8x128xf32>
    %212 = tpu.matmul %211, %210, %cst_58 {dimension_numbers = #tpu.dot_dimension_numbers<[1], [0], [0], [1], [0, 0, 1, 1], [], []>} : vector<8x32xbf16>, vector<32x128xbf16>, vector<8x128xf32> -> vector<8x128xf32>
    %213 = vector.broadcast %9 : vector<1x128xf32> to vector<8x128xf32>
    %214 = arith.addf %212, %213 : vector<8x128xf32>
    %c0_59 = arith.constant 0 : index
    %c0_60 = arith.constant 0 : index
    %c0_61 = arith.constant 0 : index
    %215 = vector.load %arg4[%c0_59, %c0_60, %c0_61] : memref<1x8x128xf32, #tpu.memory_space<vmem>>, vector<1x8x128xf32>
    %216 = vector.shape_cast %215 : vector<1x8x128xf32> to vector<8x128xf32>
    %217 = vector.shape_cast %214 : vector<8x128xf32> to vector<1x8x128xf32>
    tpu.vector_store %arg4[%c0_59, %c0_60, %c0_61], %217 {strides = array<i32>} : memref<1x8x128xf32, #tpu.memory_space<vmem>>, vector<1x8x128xf32>,
    return
  }
  func.func @transform_0(%arg0: i32) -> (i32, i32, i32) {
    %c0_i32 = arith.constant 0 : i32
    %c0_i32_0 = arith.constant 0 : i32
    %c0_i32_1 = arith.constant 0 : i32
    return %arg0, %c0_i32, %c0_i32_0 : i32, i32, i32
  }
  func.func @transform_1(%arg0: i32) -> (i32, i32) {
    %c0_i32 = arith.constant 0 : i32
    %c0_i32_0 = arith.constant 0 : i32
    %c0_i32_1 = arith.constant 0 : i32
    return %c0_i32, %c0_i32_0 : i32, i32
  }
  func.func @transform_2(%arg0: i32) -> (i32, i32) {
    %c0_i32 = arith.constant 0 : i32
    %c0_i32_0 = arith.constant 0 : i32
    %c0_i32_1 = arith.constant 0 : i32
    return %c0_i32, %c0_i32_0 : i32, i32
  }
  func.func @transform_3(%arg0: i32) -> (i32, i32, i32) {
    %c0_i32 = arith.constant 0 : i32
    %c0_i32_0 = arith.constant 0 : i32
    %c0_i32_1 = arith.constant 0 : i32
    return %arg0, %c0_i32, %c0_i32_0 : i32, i32, i32
  }
}

</mosaic_0001>

<bundles_post_ra>
// kernel: tpu_custom_call.1
= control target key start
LH: loop header
LB: loop body
LE: loop exit
PB: predicated region body
PF: predicated region fallthrough
CT: control target
= control target key end

     0   :  { %8 = vsyncpa [#allocation3], 0  ;;  %s2528_s0 = inlined_call_operand.hbm [shape: f32[2,8,32], index: 0, kind: input, shape index: {}]   ;;  %s2529_s1 = inlined_call_operand.hbm [shape: bf16[480,128], index: 1, kind: input, shape index: {}]   ;;  %s2530_s2 = inlined_call_operand.hbm [shape: f32[96,128], index: 2, kind: input, shape index: {}]   ;;  %s2531_s3 = inlined_call_operand.hbm [shape: f32[2,8,128], index: 3, kind: output, shape index: {}]  }
   0x1   :  { %10 = vsyncpa [#allocation3 + $0x1], 0 }
   0x2   :  { %11 = vsyncpa [#allocation6], 0 }
   0x3   :  { %12 = vsyncpa [#allocation4], 0 }
   0x4   :  { %14 = vsyncpa [#allocation4 + $0x1], 0  ;;  %s2104_s12 = smov 0   ;;  %s2106_s13 = smov 0  }
   0x5   :  { %s2108_s14 = smov 0   ;;  %s2110_s15 = smov 0  }
   0x6 LB: > { %s2125_s16 = sadd.s32 4294967295, %s2069_s15   ;;  %s1529_s17 = sadd.s32 4294967294, %s2069_s15   ;;  %s2069_s15 = sphi %s2110_s15, %s2553_s15   ;;  %s2065_s14 = sphi %s2108_s14, %s2552_s14   ;;  %s2061_s13 = sphi %s2106_s13, %s2551_s13   ;;  %s2057_s12 = sphi %s2104_s12, %s2550_s12  }
   0x7   : > { %p40_p0 = scmp.ne.s32.totalorder %s2061_s13, %s2057_s12  ;;  %p2532_p1 = scmp.eq.s32.totalorder %s2125_s16, 0 }
   0x8   : > { %p112_p3 = scmp.eq.s32.totalorder %s1529_s17, 1  ;;  %p1530_p5 = scmp.ge.s32.totalorder %s2069_s15, 1 }
   0x9   : > { %p2134_p4 = por %p2532_p1, %p40_p0  ;;  %p119_p7 = scmp.lt.s32.totalorder %s2069_s15, 3 }
   0xa   : > { %p2139_p6 = por %p112_p3, %p40_p0  ;;  %s2071_s21 = smov [#allocation5]  }
   0xb   : > { %s2536_s18 = scalar_select %p2134_p4, 1, 0 }
   0xc   : > { %s2537_s19 = scalar_select %p2139_p6, 1, 0 }
   0xd   : > { %p2144_p8 = pnand %p1530_p5, %p119_p7  ;;  %s131_s22 = sshll.u32 %s2071_s21, 4  ;;  %s132_s22 = int_to_ptr.vmem [resolvable:$true] %s131_s22 }
   0xe   : > { %s2072_s24 = smov [#allocation7]   ;;  %s1932_s26 = scalar_lea.vmem %s132_s22, 3840 }
   0xf   : > { %s2538_s20 = scalar_select %p2144_p8, 1, 0 }
  0x10   : > { %p1811_p9 = pneg %p2144_p8  ;;  %s144_s25 = sshll.u32 %s2072_s24, 4  ;;  %s145_s25 = int_to_ptr.vmem [resolvable:$true] %s144_s25 }
  0x11   : > { %p1933_p13 = scmp.ne.s32.totalorder %s132_s22, %s1932_s26  ;;  %p1940_p5 = scmp.lt.s32.totalorder %s132_s22, %s132_s22 }
  0x12   : > { %p2153_p11 = pnand %p1811_p9, %p2532_p1  ;;  %p1941_p7 = scmp.lt.s32.totalorder %s1932_s26, %s1932_s26 }
  0x14   : > { %p1923_p12 = pneg %p2153_p11  ;;  %p1942_p10 = por %p1941_p7, %p1940_p5 }
  0x16   : > { %p1935_p0 = pnand %p1933_p13, %p1923_p12 }
  0x18   : > { %p1936_p3 = pneg %p1935_p0 }
  0x1a   : > { %p1943_p9 = pnand %p1942_p10, %p1936_p3 }
  0x1c   : > { %1946 = shalt.err (!%p1943_p9)
}
  0x1d   : > { %s2073_s27 = smov 64   ;;  %s2074_s28 = smov 4  }
  0x1e   : > { %1814 = dma.hbm_to_vmem [thread:$0]  (!%p2153_p11), %s2529_s1, 3840, %s132_s22, [#allocation6], %s2073_s27, %s2073_s27, %s2074_s28  }
  0x1f   : > { %s1958_s4 = scalar_lea.vmem %s145_s25, 1536  ;;  %p1966_p2 = scmp.lt.s32.totalorder %s145_s25, %s145_s25 }
  0x20   : > { %p1959_p1 = scmp.ne.s32.totalorder %s145_s25, %s1958_s4  ;;  %p1967_p6 = scmp.lt.s32.totalorder %s1958_s4, %s1958_s4 }
  0x22   : > { %p1961_p13 = pnand %p1959_p1, %p1923_p12  ;;  %p1968_p5 = por %p1967_p6, %p1966_p2 }
  0x24   : > { %p1962_p0 = pneg %p1961_p13 }
  0x26   : > { %p1969_p10 = pnand %p1968_p5, %p1962_p0 }
  0x28   : > { %1972 = shalt.err (!%p1969_p10)
}
  0x29   : > { %s2075_s5 = smov 128   ;;  %s2076_s6 = smov 8  }
  0x2a   : > { %1817 = dma.hbm_to_vmem [thread:$0]  (!%p2153_p11), %s2530_s2, 1536, %s145_s25, [#allocation6], %s2075_s5, %s2075_s5, %s2076_s6  }
  0x2b   : > { %s2176_s9 = sadd.s32 1, %s2069_s15   ;;  %s27_s11 = sadd.s32 1, %s2065_s14 }
  0x2c   : > { %s24_s10 = ssub.s32 %s2069_s15, %s2176_s9  ;;  %p34_p2 = scmp.ne.s32.totalorder %s2065_s14, %s2061_s13 }
  0x2d   : > { %p25_p1 = scmp.eq.s32.totalorder %s24_s10, 0  ;;  %p35_p6 = scmp.eq.s32.totalorder %s2069_s15, 0 }
  0x2e   : > { %p2540_p3 = scmp.eq.s32.totalorder %s2125_s16, 1  ;;  %p1828_p9 = scmp.lt.s32.totalorder %s2069_s15, 2 }
  0x2f   : > { %s2185_s17 = scalar_select %p25_p1, %s2065_s14, %s27_s11  }
  0x30   : > { %p36_p12 = por %p35_p6, %p34_p2  ;;  %p2189_p7 = por %p2540_p3, %p34_p2 }
  0x31   : > { %s158_s22 = sand.u32 1, %s2065_s14   ;;  %s1535_s24 = sshll.u32 %s2069_s15, 7 }
  0x32   : > { %s2541_s21 = scalar_select %p2189_p7, 1, 0 }
  0x33   : > { %s1534_s23 = sshll.u32 %s158_s22, 3  ;;  %s2199_s27 = scalar_lea.hbm %s2528_s0, %s1535_s24 }
  0x34   : > { %s162_s28 = scalar_lea.vmem [#allocation2], %s1534_s23  ;;  %p2201_p11 = pnand %p1828_p9, %p36_p12 }
  0x35   : > { %s169_s29 = sshll.u32 %s162_s28, 4  ;;  %s159_s4 = scalar_lea.sflag [#allocation3], %s158_s22  ;;  %s170_s29 = int_to_ptr.vmem [resolvable:$true] %s169_s29 }
  0x36   : > { %s1973_s5 = scalar_lea.hbm %s2199_s27, 128  ;;  %p1975_p0 = pneg %p2201_p11 }
  0x37   : > { %p1974_p13 = scmp.ne.s32.totalorder %s2199_s27, %s1973_s5  ;;  %s1978_s8 = scalar_lea.hbm %s2528_s0, 256 }
  0x38   : > { %p1979_p1 = scmp.lt.s32.totalorder %s2199_s27, %s2528_s0  ;;  %p1980_p2 = scmp.lt.s32.totalorder %s1978_s8, %s1973_s5 }
  0x39   : > { %p1976_p5 = pnand %p1975_p0, %p1974_p13 }
  0x3a   : > { %p1981_p6 = por %p1980_p2, %p1979_p1 }
  0x3b   : > { %p1977_p10 = pneg %p1976_p5 }
  0x3d   : > { %p1982_p12 = pnand %p1981_p6, %p1977_p10 }
  0x3f   : > { %1985 = shalt.err (!%p1982_p12)
}
  0x40   : > { %s1986_s23 = scalar_lea.vmem %s170_s29, 128  ;;  %s2077_s22 = smov [#allocation2]  }
  0x41   : > { %p1987_p3 = scmp.ne.s32.totalorder %s170_s29, %s1986_s23  ;;  %s1991_s24 = sshll.u32 %s2077_s22, 4  ;;  %s1992_s24 = int_to_ptr.vmem [resolvable:$false] %s1991_s24 }
  0x42   : > { %s1993_s25 = scalar_lea.vmem %s1992_s24, 256  ;;  %p1994_p13 = scmp.lt.s32.totalorder %s170_s29, %s1992_s24 }
  0x43   : > { %p1989_p9 = pnand %p1987_p3, %p1975_p0  ;;  %p1995_p5 = scmp.lt.s32.totalorder %s1993_s25, %s1986_s23 }
  0x45   : > { %p1990_p7 = pneg %p1989_p9  ;;  %p1996_p4 = por %p1995_p5, %p1994_p13 }
  0x47   : > { %p1997_p8 = pnand %p1996_p4, %p1990_p7 }
  0x49   : > { %2000 = shalt.err (!%p1997_p8)
}
  0x4a   : > { %1821 = dma.hbm_to_vmem [thread:$0]  (!%p2201_p11), %s2199_s27, 128, %s170_s29, %s159_s4  }
  0x4b   : > { %p2543_p10 = scmp.ne.s32.totalorder %s2538_s20, 0 }
  0x4c   : > { %s2222_s26 = sand.u32 (!%p2543_p10), 1, %s2061_s13   ;;  %p2544_p4 = scmp.ne.s32.totalorder (!%p2543_p10), %s2536_s18, 0 }
  0x4d   : > { %178 = sbr.rel (%p2543_p10) target bundleno = 4900 (0x1324), region = 32  ;;  %s1537_s28 = sshll.u32 (!%p2543_p10), %s2222_s26, 3 }
  0x4e   : > { %s181_s5 = scalar_lea.sflag (!%p2543_p10), [#allocation3], %s2222_s26  ;;  %s184_s6 = scalar_lea.vmem (!%p2543_p10), [#allocation2], %s1537_s28 }
  0x52   : > { %2044 = dma.done.wait (%p2544_p4), %s181_s5, 128  }
  0x53   : > { %2046 = vsyncadd (%p2544_p4), %s181_s5, 4294967168  ;;  %p2545_p8 = scmp.eq.s32.totalorder %s2125_s16, 0 }
  0x55   : > { %2048 = dma.done.wait (%p2545_p8), [#allocation6], 5376   ;;  %p2546_p7 = pmov %p2545_p8 }
  0x56   : > { %vm256_vm0 = vcmask 261120   ;;  %v2236_v0 = vld [vmem:[%s184_s6] sm:$0xff]  ;;  %v1875_v7 = vld [vmem:[#allocation5 + $0x8] sm:$0xff]   ;;  %v2078_v8 = vmov 0.0   ;;  %vm2079_vm1 = vmmov 0   ;;  %v1876_v9 = vld [vmem:[#allocation5] sm:$0xff]   ;;  %v271_v17 = vlaneseq }
  0x57   : > { %2050 = vsyncadd (%p2546_p7), [#allocation6], 4294961920  ;;  %v257_v1 = vsel %vm256_vm0, %v2236_v0, 0.0  ;;  %1649 = vmatprep.subr.bf16.mxu1 %v2078_v8  ;;  %1653 = vmatprep.mubr.msk.bf16.mxu1 %vm2079_vm1, %v2078_v8  ;;  %v218_v10 = vld [vmem:[#allocation7 + $0x8] sm:$0xff]  ;;  %v220_v11 = vld [vmem:[#allocation7 + $0x18] sm:$0xff]  ;;  %s2080_s18 = smov 32  }
  0x58   : > { %258 = vadd.xlane.f32.xlu0 %v257_v1  ;;  %1650 = vmatpush3.bf16.msra.mxu1 %v1875_v7  ;;  %v221_v12 = vld [vmem:[#allocation7 + $0x20] sm:$0xff]  ;;  %s2081_s20 = smov 64   ;;  %v219_v13 = vld [vmem:[#allocation7 + $0x10] sm:$0xff]  ;;  %v2254_v18 = vshrl.u32 %v271_v17, 7  ;;  %v2259_v20 = vld [vmem:[#allocation7 + $0x48] sm:$0xff]  ;;  %s2082_s27 = smov 96  }
  0x59   : > { %1665 = vmatprep.subr.mxu0 %v2078_v8  ;;  %1651 = vmatprep.subr.bf16.mxu1 %v2078_v8  ;;  %v2305_v59 = vld [vmem:[#allocation7] sm:$0xff]  ;;  %s1585_s29 = sshll.u32 %s2125_s16, 7  ;;  %s214_s30 = scalar_lea.vmem [#allocation8], %s1537_s28 }
  0x5a   : > { %1673 = vmatprep.mubr.msk.f32.mxu0 %vm2079_vm1, %v2078_v8  ;;  %345 = vrot.lane.b32.xlu1 %v220_v11, %s2080_s18  ;;  %v2257_v19 = vsub.s32 0, %v2254_v18  ;;  %v278_v21 = vsub.s32 1, %v2254_v18  ;;  %s1440_s4 = sshll.u32 %s214_s30, 4  ;;  %s2485_s10 = scalar_lea.hbm %s2531_s3, %s1585_s29  ;;  %s2487_s4 = int_to_ptr.vmem [resolvable:$true] %s1440_s4 }
  0x5b   : > { %s1427_s11 = scalar_lea.sflag [#allocation4], %s2222_s26  ;;  %s2001_s16 = scalar_lea.vmem %s2487_s4, 128 }
  0x5c   : > { %1652 = vmatpush3.bf16.msra.mxu1 %v1876_v9  ;;  %v274_v22 = vrot.slane %v2259_v20, %v2257_v19  ;;  %v279_v25 = vrot.slane %v2259_v20, %v278_v21  ;;  %p2002_p11 = scmp.ne.s32.totalorder %s2487_s4, %s2001_s16  ;;  %p2547_p0 = scmp.ne.s32.totalorder %s2541_s21, 0 }
  0x5d   : > { %1657 = vmatprep.subr.bf16.mxu1 %v2078_v8  ;;  %s2083_s23 = smov [#allocation8]  }
  0x5e   : > { %347 = vrot.lane.b32.xlu1 %v221_v12, %s2080_s18  ;;  %p2003_p1 = pnand %p2002_p11, %p2547_p0  ;;  %s2005_s22 = sshll.u32 %s2083_s23, 4  ;;  %s2006_s22 = int_to_ptr.vmem [resolvable:$false] %s2005_s22 }
  0x5f   : > { %s2007_s24 = scalar_lea.vmem %s2006_s22, 256  ;;  %p2008_p6 = scmp.lt.s32.totalorder %s2487_s4, %s2006_s22 }
  0x60   : > { %p2004_p2 = pneg %p2003_p1  ;;  %p2009_p12 = scmp.lt.s32.totalorder %s2007_s24, %s2001_s16 }
  0x62   : > { %343 = vrot.lane.b32.xlu1 %v219_v13, %s2080_s18  ;;  %p2010_p3 = por %p2009_p12, %p2008_p6 }
  0x64   : > { %p2011_p9 = pnand %p2010_p3, %p2004_p2 }
  0xcc   : > { %v2274_v31 = vpop.permute.xlu1 %345 }
  0xd0   : > { %v2278_v33 = vpop.permute.xlu1 %347 }
  0xd4   : > { %v2282_v35 = vpop.permute.xlu1 %343 }
  0xe1   : > { %v259_v2 = vpop.xlane.xlu0 %258 }
  0xe2   : > { %v261_v3 = vmul.f32 0.03125, %v259_v2 }
  0xe4   : > { %v262_v4 = vsub.f32 %v2236_v0, %v261_v3  ;;  %v2309_v3 = vld [vmem:[#allocation7 + $0x40] sm:$0xff] }
  0xe5   : > { %1666 = vmatpush3.msra.mxu0 %v2309_v3 }
  0xe6   : > { %v263_v5 = vmul.f32 %v262_v4, %v262_v4  ;;  %1667 = vmatprep.subr.mxu0 %v2078_v8 }
  0xe8   : > { %v264_v6 = vsel %vm256_vm0, %v263_v5, 0.0  ;;  %v2315_v5 = vld [vmem:[#allocation7 + $0x30] sm:$0xff] }
  0xe9   : > { %265 = vadd.xlane.f32.xlu0 %v264_v6  ;;  %v2319_v6 = vld [vmem:[#allocation7 + $0x28] sm:$0xff] }
  0xff   : > { %341 = vrot.lane.b32.xlu0 %v218_v10, %s2080_s18 }
 0x103   : > { %363 = vrot.lane.b32.xlu0 %v220_v11, %s2081_s20 }
 0x107   : > { %365 = vrot.lane.b32.xlu0 %v221_v12, %s2081_s20 }
 0x10b   : > { %359 = vrot.lane.b32.xlu0 %v218_v10, %s2081_s20 }
 0x10f   : > { %361 = vrot.lane.b32.xlu0 %v219_v13, %s2081_s20 }
 0x172   : > { %v266_v14 = vpop.xlane.xlu0 %265 }
 0x173   : > { %v267_v15 = vmul.f32 0.03125, %v266_v14  ;;  %v1877_v14 = vld [vmem:[#allocation5 + $0x18] sm:$0xff]  }
 0x175   : > { %v268_v16 = vadd.f32 1e-05, %v267_v15  ;;  %v1878_v15 = vld [vmem:[#allocation5 + $0x10] sm:$0xff]  }
 0x176   : > { %v2270_v29 = vpop.permute.xlu0 %341 }
 0x177   : > { %1905 = vrsqrt.f32 %v268_v16 }
 0x17a   : > { %v2272_v30 = vpop.permute.xlu0 %363 }
 0x17e   : > { %v2276_v32 = vpop.permute.xlu0 %365 }
 0x182   : > { %v2280_v34 = vpop.permute.xlu0 %359 }
 0x184   : > { %v1906_v23 = vpop.eup %1905 }
 0x185   : > { %v270_v24 = vmul.f32 %v1906_v23, %v262_v4  ;;  %v2311_v4 = vld [vmem:[#allocation7 + $0x38] sm:$0xff] }
 0x186   : > { %v2284_v37 = vpop.permute.xlu0 %361  ;;  %1668 = vmatpush3.msra.mxu0 %v2311_v4 }
 0x187   : > { %v275_v26 = vmul.f32 %v274_v22, %v270_v24  ;;  %1669 = vmatprep.subr.mxu0 %v2078_v8 }
 0x188   : > { %1670 = vmatpush3.msra.mxu0 %v2315_v5 }
 0x189   : > { %v280_v27 = vadd.f32 %v279_v25, %v275_v26  ;;  %1671 = vmatprep.subr.mxu0 %v2078_v8 }
 0x18a   : > { %1672 = vmatpush3.msra.mxu0 %v2319_v6 }
 0x18b   : > { %v281_v28 = vpack.c.bf16 %v280_v27, %v280_v27  ;;  %1676 = vmatprep.subr.bf16.mxu0 %v2078_v8 }
 0x18d   : > { %1654 = vmatmul.mubr.msk.bf16.vlgmr.msra.gmra.mxu1 %vm256_vm0, %v281_v28 }
 0x18e   : > { %1661 = vmatprep.mubr.msk.bf16.mxu1 %vm2079_vm1, %v2078_v8 }
 0x24d   : > { %v331_v36 = vpop.f32.mrf.mxu1 }
 0x24e   : > { %v355_v38 = vmul.f32 %v2274_v31, %v331_v36  ;;  %v356_v39 = vmul.f32 %v2278_v33, %v331_v36  ;;  %v373_v41 = vmul.f32 %v2272_v30, %v331_v36  ;;  %v374_v42 = vmul.f32 %v2276_v32, %v331_v36 }
 0x24f   : > { %v1655_v40 = vpop.f32.mrf.mxu1  ;;  %v353_v44 = vmul.f32 %v2270_v29, %v331_v36  ;;  %v354_v45 = vmul.f32 %v2282_v35, %v331_v36  ;;  %v371_v46 = vmul.f32 %v2280_v34, %v331_v36  ;;  %v372_v47 = vmul.f32 %v2284_v37, %v331_v36 }
 0x250   : > { %v358_v43 = vpack.c.bf16 %v356_v39, %v355_v38  ;;  %v376_v49 = vpack.c.bf16 %v374_v42, %v373_v41  ;;  %v377_v57 = vpack.c.bf16 %v331_v36, %v331_v36  ;;  %v627_v38 = vsub.s32 4, %v2254_v18 }
 0x251   : > { %v334_v48 = vpop.f32.mrf.mxu1  ;;  %v357_v51 = vpack.c.bf16 %v354_v45, %v353_v44  ;;  %v375_v52 = vpack.c.bf16 %v372_v47, %v371_v46 }
 0x252   : > { %382 = vrot.lane.b32.xlu1 %v358_v43, %s2082_s27  ;;  %521 = vrot.lane.b32.xlu0 %v376_v49, %s2081_s20  ;;  %v628_v39 = vrot.slane %v2259_v20, %v627_v38 }
 0x253   : > { %v1656_v50 = vpop.f32.mrf.mxu1 }
 0x256   : > { %380 = vrot.lane.b32.xlu1 %v357_v51, %s2082_s27  ;;  %519 = vrot.lane.b32.xlu0 %v375_v52, %s2081_s20  ;;  %v1879_v52 = vld [vmem:[#allocation5 + $0x28] sm:$0xff]  }
 0x2c4   : > { %v383_v53 = vpop.permute.xlu1 %382  ;;  %v522_v11 = vpop.permute.xlu0 %521 }
 0x2c5   : > { %v391_v54 = vsel %vm256_vm0, %v383_v53, 0  ;;  %v1881_v53 = vld [vmem:[#allocation5 + $0x68] sm:$0xff]  }
 0x2c6   : > { %1658 = vmatpush3.bf16.xpose.msra.mxu1 %v391_v54  ;;  %v1882_v54 = vld [vmem:[#allocation5 + $0x60] sm:$0xff]  }
 0x2c7   : > { %1659 = vmatprep.subr.bf16.mxu1 %v2078_v8 }
 0x2c8   : > { %v381_v55 = vpop.permute.xlu1 %380  ;;  %v520_v13 = vpop.permute.xlu0 %519 }
 0x2c9   : > { %v388_v56 = vsel %vm256_vm0, %v381_v55, 0  ;;  %v1883_v55 = vld [vmem:[#allocation5 + $0x58] sm:$0xff]  }
 0x2ce   : > { %1660 = vmatpush3.bf16.xpose.msra.mxu1 %v388_v56  ;;  %v1884_v56 = vld [vmem:[#allocation5 + $0x50] sm:$0xff]  }
 0x2cf   : > { %1684 = vmatprep.subr.bf16.mxu1 %v2078_v8 }
 0x2d5   : > { %1662 = vmatmul.mubr.msk.bf16.vlgmr.msra.gmra.mxu1 %vm256_vm0, %v377_v57  ;;  %v1885_v57 = vld [vmem:[#allocation5 + $0x48] sm:$0xff]  }
 0x2d6   : > { %1688 = vmatprep.mubr.msk.bf16.mxu1 %vm2079_vm1, %v2078_v8  ;;  %1685 = vmatpush3.bf16.msra.mxu1 %v1877_v14  ;;  %v1887_v14 = vld [vmem:[#allocation5 + $0x38] sm:$0xff]  }
 0x2d7   : > { %1686 = vmatprep.subr.bf16.mxu1 %v2078_v8 }
 0x2da   : > { %1687 = vmatpush3.bf16.msra.mxu1 %v1878_v15  ;;  %v1888_v15 = vld [vmem:[#allocation5 + $0x30] sm:$0xff]  }
 0x2db   : > { %1700 = vmatprep.subr.bf16.mxu1 %v2078_v8 }
 0x395   : > { %v427_v58 = vpop.f32.mrf.mxu1 }
 0x396   : > { %v433_v60 = vmul.f32 5.656854, %v427_v58  ;;  %v1886_v58 = vld [vmem:[#allocation5 + $0x40] sm:$0xff]  }
 0x397   : > { %v1663_v61 = vpop.f32.mrf.mxu1 }
 0x398   : > { %v434_v62 = vadd.f32 %v433_v60, %v2305_v59 }
 0x399   : > { %v430_v63 = vpop.f32.mrf.mxu1 }
 0x39a   : > { %v435_v1 = vsel %vm256_vm0, %v434_v62, -inf  ;;  %v645_v63 = vsub.s32 2, %v2254_v18 }
 0x39b   : > { %436 = vmax.xlane.f32.xlu1 %v435_v1  ;;  %v1664_v2 = vpop.f32.mrf.mxu1  ;;  %v650_v1 = vsub.s32 3, %v2254_v18 }
 0x39c   : > { %v646_v2 = vrot.slane %v2259_v20, %v645_v63 }
 0x424   : > { %v437_v7 = vpop.xlane.xlu1 %436 }
 0x425   : > { %v438_v9 = vsub.f32 %v434_v62, %v437_v7 }
 0x427   : > { %v439_v10 = vmul.f32 1.442695, %v438_v9 }
 0x429   : > { %1907 = vpow2.f32 %v439_v10  ;;  %v651_v10 = vrot.slane %v2259_v20, %v650_v1 }
 0x436   : > { %v1908_v12 = vpop.eup %1907 }
 0x437   : > { %1674 = vmatmul.mubr.msk.f32.vlgmr.msra.gmra.mxu0 %vm256_vm0, %v1908_v12 }
 0x438   : > { %1677 = vmatpush3.bf16.msra.mxu0 %v522_v11  ;;  %1680 = vmatprep.mubr.msk.bf16.mxu0 %vm2079_vm1, %v2078_v8 }
 0x439   : > { %1678 = vmatprep.subr.bf16.mxu0 %v2078_v8 }
 0x43c   : > { %1679 = vmatpush3.bf16.msra.mxu0 %v520_v13 }
 0x43d   : > { %1692 = vmatprep.subr.bf16.mxu0 %v2078_v8 }
 0x4f7   : > { %v510_v16 = vpop.f32.mrf.mxu0 }
 0x4f8   : > { %1909 = vrcp.f32 %v510_v16  ;;  %v656_v16 = vsub.s32 6, %v2254_v18 }
 0x4f9   : > { %v1675_v17 = vpop.f32.mrf.mxu0 }
 0x4fa   : > { %v657_v17 = vrot.slane %v2259_v20, %v656_v16 }
 0x505   : > { %v1910_v22 = vpop.eup %1909 }
 0x506   : > { %v515_v23 = vmul.f32 %v1910_v22, %v1908_v12 }
 0x508   : > { %v516_v24 = vpack.c.bf16 %v515_v23, %v515_v23 }
 0x50a   : > { %1681 = vmatmul.mubr.msk.bf16.vlgmr.msra.gmra.mxu0 %vm256_vm0, %v516_v24 }
 0x50b   : > { %1696 = vmatprep.mubr.msk.bf16.mxu0 %vm2079_vm1, %v2078_v8  ;;  %1693 = vmatpush3.bf16.msra.mxu0 %v1879_v52 }
 0x50c   : > { %1694 = vmatprep.subr.bf16.mxu0 %v2078_v8 }
 0x5ca   : > { %v562_v25 = vpop.f32.mrf.mxu0 }
 0x5cb   : > { %v568_v26 = vpack.c.bf16 %v562_v25, %v562_v25 }
 0x5cc   : > { %v1682_v27 = vpop.f32.mrf.mxu0 }
 0x5cd   : > { %1689 = vmatmul.mubr.msk.bf16.vlgmr.msra.gmra.mxu1 %vm256_vm0, %v568_v26 }
 0x5ce   : > { %v565_v28 = vpop.f32.mrf.mxu0  ;;  %1716 = vmatprep.mubr.msk.bf16.mxu1 %vm2079_vm1, %v2078_v8  ;;  %1701 = vmatpush3.bf16.msra.mxu1 %v1881_v53 }
 0x5cf   : > { %1702 = vmatprep.subr.bf16.mxu1 %v2078_v8 }
 0x5d0   : > { %v1683_v36 = vpop.f32.mrf.mxu0 }
 0x5d1   : > { %v806_v36 = vsub.s32 5, %v2254_v18 }
 0x5d2   : > { %1703 = vmatpush3.bf16.msra.mxu1 %v1882_v54 }
 0x5d3   : > { %1704 = vmatprep.subr.bf16.mxu1 %v2078_v8 }
 0x5d6   : > { %1705 = vmatpush3.bf16.msra.mxu1 %v1883_v55  ;;  %v2389_v55 = vld [vmem:[#allocation7 + $0x50] sm:$0xff] }
 0x5d7   : > { %1706 = vmatprep.subr.bf16.mxu1 %v2078_v8 }
 0x5da   : > { %1707 = vmatpush3.bf16.msra.mxu1 %v1884_v56  ;;  %v854_v56 = vrot.slane %v2389_v55, %v2257_v19 }
 0x5db   : > { %1708 = vmatprep.subr.bf16.mxu1 %v2078_v8 }
 0x5de   : > { %1709 = vmatpush3.bf16.msra.mxu1 %v1885_v57 }
 0x5df   : > { %1710 = vmatprep.subr.bf16.mxu1 %v2078_v8 }
 0x5e2   : > { %1711 = vmatpush3.bf16.msra.mxu1 %v1886_v58  ;;  %v859_v58 = vrot.slane %v2389_v55, %v278_v21 }
 0x5e3   : > { %1712 = vmatprep.subr.bf16.mxu1 %v2078_v8 }
 0x5e6   : > { %1713 = vmatpush3.bf16.msra.mxu1 %v1887_v14 }
 0x5e7   : > { %1714 = vmatprep.subr.bf16.mxu1 %v2078_v8 }
 0x5ea   : > { %1715 = vmatpush3.bf16.msra.mxu1 %v1888_v15 }
 0x5eb   : > { %1747 = vmatprep.subr.bf16.mxu1 %v2078_v8 }
 0x68d   : > { %v618_v40 = vpop.f32.mrf.mxu1 }
 0x68e   : > { %v624_v41 = vadd.f32 %v618_v40, %v2236_v0  ;;  %v1880_v0 = vld [vmem:[#allocation5 + $0x20] sm:$0xff]  }
 0x68f   : > { %v1690_v42 = vpop.f32.mrf.mxu1  ;;  %1695 = vmatpush3.bf16.msra.mxu0 %v1880_v0 }
 0x690   : > { %v2343_v43 = vadd.f32 %v628_v39, %v624_v41  ;;  %1720 = vmatprep.subr.bf16.mxu0 %v2078_v8  ;;  %v807_v39 = vrot.slane %v2259_v20, %v806_v36  ;;  %v1889_v20 = vld [vmem:[#allocation5 + $0x78] sm:$0xff]  }
 0x691   : > { %v621_v44 = vpop.f32.mrf.mxu1 }
 0x692   : > { %v630_v45 = vsel %vm256_vm0, %v2343_v43, 0.0 }
 0x693   : > { %631 = vadd.xlane.f32.xlu0 %v630_v45  ;;  %v1691_v46 = vpop.f32.mrf.mxu1 }
 0x71c   : > { %v632_v47 = vpop.xlane.xlu0 %631 }
 0x71d   : > { %v633_v48 = vmul.f32 0.03125, %v632_v47 }
 0x71f   : > { %v634_v49 = vsub.f32 %v2343_v43, %v633_v48 }
 0x721   : > { %v635_v50 = vmul.f32 %v634_v49, %v634_v49 }
 0x723   : > { %v636_v51 = vsel %vm256_vm0, %v635_v50, 0.0 }
 0x724   : > { %637 = vadd.xlane.f32.xlu1 %v636_v51 }
 0x7ad   : > { %v638_v60 = vpop.xlane.xlu1 %637 }
 0x7ae   : > { %v639_v61 = vmul.f32 0.03125, %v638_v60 }
 0x7b0   : > { %v640_v62 = vadd.f32 1e-05, %v639_v61 }
 0x7b2   : > { %1911 = vrsqrt.f32 %v640_v62 }
 0x7bf   : > { %v1912_v7 = vpop.eup %1911 }
 0x7c0   : > { %v642_v9 = vmul.f32 %v1912_v7, %v634_v49 }
 0x7c2   : > { %v647_v11 = vmul.f32 %v646_v2, %v642_v9 }
 0x7c4   : > { %v652_v12 = vadd.f32 %v651_v10, %v647_v11 }
 0x7c6   : > { %v653_v13 = vpack.c.bf16 %v652_v12, %v652_v12 }
 0x7c8   : > { %1697 = vmatmul.mubr.msk.bf16.vlgmr.msra.gmra.mxu0 %vm256_vm0, %v653_v13 }
 0x7c9   : > { %1724 = vmatprep.mubr.msk.bf16.mxu0 %vm2079_vm1, %v2078_v8  ;;  %1721 = vmatpush3.bf16.msra.mxu0 %v1889_v20 }
 0x7ca   : > { %1722 = vmatprep.subr.bf16.mxu0 %v2078_v8 }
 0x888   : > { %v707_v22 = vpop.f32.mrf.mxu0 }
 0x889   : > { %v708_v23 = vadd.f32 %v707_v22, %v657_v17 }
 0x88a   : > { %v1698_v24 = vpop.f32.mrf.mxu0 }
 0x88b   : > { %v713_v25 = vmax.f32 %v708_v23, 0.0 }
 0x88c   : > { %v710_v26 = vpop.f32.mrf.mxu0 }
 0x88d   : > { %v714_v27 = vpack.c.bf16 %v713_v25, %v713_v25 }
 0x88e   : > { %v1699_v28 = vpop.f32.mrf.mxu0 }
 0x88f   : > { %1717 = vmatmul.mubr.bf16.vlgmr.msra.gmra.mxu1 %v714_v27 }
 0x890   : > { %1751 = vmatprep.mubr.msk.bf16.mxu1 %vm2079_vm1, %v2078_v8 }
 0x94f   : > { %v797_v40 = vpop.f32.mrf.mxu1 }
 0x950   : > { %v803_v41 = vadd.f32 %v797_v40, %v2343_v43  ;;  %v1890_v43 = vld [vmem:[#allocation5 + $0x70] sm:$0xff]  }
 0x951   : > { %v1718_v42 = vpop.f32.mrf.mxu1  ;;  %1723 = vmatpush3.bf16.msra.mxu0 %v1890_v43 }
 0x952   : > { %v2381_v44 = vadd.f32 %v807_v39, %v803_v41  ;;  %1728 = vmatprep.subr.bf16.mxu0 %v2078_v8 }
 0x953   : > { %v800_v45 = vpop.f32.mrf.mxu1 }
 0x954   : > { %v838_v46 = vsel %vm256_vm0, %v2381_v44, 0.0 }
 0x955   : > { %839 = vadd.xlane.f32.xlu1 %v838_v46  ;;  %v1719_v47 = vpop.f32.mrf.mxu1 }
 0x9de   : > { %v840_v48 = vpop.xlane.xlu1 %839 }
 0x9df   : > { %v841_v49 = vmul.f32 0.03125, %v840_v48 }
 0x9e1   : > { %v842_v50 = vsub.f32 %v2381_v44, %v841_v49 }
 0x9e3   : > { %v843_v51 = vmul.f32 %v842_v50, %v842_v50 }
 0x9e5   : > { %v844_v52 = vsel %vm256_vm0, %v843_v51, 0.0  ;;  %v1892_v51 = vld [vmem:[#allocation5 + $0x80] sm:$0xff]  }
 0x9e6   : > { %845 = vadd.xlane.f32.xlu1 %v844_v52 }
 0xa6f   : > { %v846_v0 = vpop.xlane.xlu1 %845 }
 0xa70   : > { %v847_v53 = vmul.f32 0.03125, %v846_v0 }
 0xa72   : > { %v848_v54 = vadd.f32 1e-05, %v847_v53 }
 0xa74   : > { %1913 = vrsqrt.f32 %v848_v54  ;;  %v1180_v54 = vrot.slane %v2389_v55, %v627_v38  ;;  %v1893_v38 = vld [vmem:[#allocation5 + $0x98] sm:$0xff]  }
 0xa81   : > { %v1914_v57 = vpop.eup %1913 }
 0xa82   : > { %v850_v60 = vmul.f32 %v1914_v57, %v842_v50 }
 0xa84   : > { %v855_v61 = vmul.f32 %v854_v56, %v850_v60 }
 0xa86   : > { %v860_v62 = vadd.f32 %v859_v58, %v855_v61 }
 0xa88   : > { %v861_v2 = vpack.c.bf16 %v860_v62, %v860_v62 }
 0xa8a   : > { %1725 = vmatmul.mubr.msk.bf16.vlgmr.msra.gmra.mxu0 %vm256_vm0, %v861_v2 }
 0xa8b   : > { %1732 = vmatprep.mubr.msk.bf16.mxu0 %vm2079_vm1, %v2078_v8 }
 0xb4a   : > { %v911_v7 = vpop.f32.mrf.mxu0 }
 0xb4b   : > { %v919_v9 = vmul.f32 %v911_v7, %v2274_v31  ;;  %v920_v10 = vmul.f32 %v911_v7, %v2278_v33  ;;  %v917_v11 = vmul.f32 %v911_v7, %v2270_v29  ;;  %v918_v12 = vmul.f32 %v911_v7, %v2282_v35 }
 0xb4c   : > { %v1726_v13 = vpop.f32.mrf.mxu0  ;;  %v925_v15 = vmul.f32 %v911_v7, %v2272_v30  ;;  %v926_v17 = vmul.f32 %v911_v7, %v2276_v32  ;;  %v923_v33 = vmul.f32 %v911_v7, %v2280_v34  ;;  %v924_v29 = vmul.f32 %v911_v7, %v2284_v37 }
 0xb4d   : > { %v922_v21 = vpack.c.bf16 %v920_v10, %v919_v9  ;;  %v921_v14 = vpack.c.bf16 %v918_v12, %v917_v11  ;;  %v929_v37 = vpack.c.bf16 %v911_v7, %v911_v7  ;;  %v1895_v13 = vld [vmem:[#allocation5 + $0xd8] sm:$0xff]  }
 0xb4e   : > { %v914_v22 = vpop.f32.mrf.mxu0  ;;  %v928_v31 = vpack.c.bf16 %v926_v17, %v925_v15  ;;  %v927_v35 = vpack.c.bf16 %v924_v29, %v923_v33  ;;  %v1898_v15 = vld [vmem:[#allocation5 + $0xc0] sm:$0xff]   ;;  %v1899_v17 = vld [vmem:[#allocation5 + $0xb8] sm:$0xff]   ;;  %v1198_v29 = vrot.slane %v2389_v55, %v645_v63  ;;  %v1903_v63 = vld [vmem:[#allocation5 + $0xe8] sm:$0xff]  }
 0xb4f   : > { %934 = vrot.lane.b32.xlu1 %v922_v21, %s2082_s27  ;;  %932 = vrot.lane.b32.xlu0 %v921_v14, %s2082_s27  ;;  %v1896_v21 = vld [vmem:[#allocation5 + $0xd0] sm:$0xff]   ;;  %v1897_v14 = vld [vmem:[#allocation5 + $0xc8] sm:$0xff]  }
 0xb50   : > { %v1727_v23 = vpop.f32.mrf.mxu0  ;;  %v1900_v22 = vld [vmem:[#allocation5 + $0xb0] sm:$0xff]  }
 0xb53   : > { %1073 = vrot.lane.b32.xlu0 %v928_v31, %s2081_s20 }
 0xb57   : > { %1071 = vrot.lane.b32.xlu0 %v927_v35, %s2081_s20 }
 0xbc1   : > { %v935_v24 = vpop.permute.xlu1 %934  ;;  %v933_v30 = vpop.permute.xlu0 %932 }
 0xbc2   : > { %v943_v32 = vsel %vm256_vm0, %v935_v24, 0  ;;  %v940_v34 = vsel %vm256_vm0, %v933_v30, 0  ;;  %v1203_v30 = vrot.slane %v2389_v55, %v650_v1  ;;  %v1209_v1 = vrot.slane %v2389_v55, %v656_v16 }
 0xbc3   : > { %1729 = vmatpush3.bf16.xpose.msra.mxu0 %v943_v32 }
 0xbc4   : > { %1730 = vmatprep.subr.bf16.mxu0 %v2078_v8 }
 0xbc5   : > { %v1074_v25 = vpop.permute.xlu0 %1073 }
 0xbc6   : > { %1748 = vmatpush3.bf16.msra.mxu1 %v1074_v25 }
 0xbc7   : > { %1749 = vmatprep.subr.bf16.mxu1 %v2078_v8 }
 0xbc9   : > { %v1072_v26 = vpop.permute.xlu0 %1071 }
 0xbca   : > { %1750 = vmatpush3.bf16.msra.mxu1 %v1072_v26 }
 0xbcb   : > { %1731 = vmatpush3.bf16.xpose.msra.mxu0 %v940_v34  ;;  %1763 = vmatprep.subr.bf16.mxu1 %v2078_v8  ;;  %v1901_v34 = vld [vmem:[#allocation5 + $0xa8] sm:$0xff]  }
 0xbcc   : > { %1736 = vmatprep.subr.mxu0 %v2078_v8 }
 0xbd2   : > { %1733 = vmatmul.mubr.msk.bf16.vlgmr.msra.gmra.mxu0 %vm256_vm0, %v929_v37  ;;  %v1902_v37 = vld [vmem:[#allocation5 + $0xa0] sm:$0xff]  }
 0xbd3   : > { %1737 = vmatpush3.msra.mxu0 %v2309_v3  ;;  %1744 = vmatprep.mubr.msk.f32.mxu0 %vm2079_vm1, %v2078_v8 }
 0xbd4   : > { %1738 = vmatprep.subr.mxu0 %v2078_v8 }
 0xbd5   : > { %1739 = vmatpush3.msra.mxu0 %v2311_v4 }
 0xbd6   : > { %1740 = vmatprep.subr.mxu0 %v2078_v8 }
 0xbd7   : > { %1741 = vmatpush3.msra.mxu0 %v2315_v5 }
 0xbd8   : > { %1742 = vmatprep.subr.mxu0 %v2078_v8 }
 0xbd9   : > { %1743 = vmatpush3.msra.mxu0 %v2319_v6  ;;  %v1891_v6 = vld [vmem:[#allocation5 + $0x88] sm:$0xff]  }
 0xbda   : > { %1755 = vmatprep.subr.bf16.mxu0 %v2078_v8 }
 0xc92   : > { %v979_v27 = vpop.f32.mrf.mxu0 }
 0xc93   : > { %v985_v28 = vmul.f32 5.656854, %v979_v27 }
 0xc94   : > { %v1734_v3 = vpop.f32.mrf.mxu0 }
 0xc95   : > { %v986_v39 = vadd.f32 %v985_v28, %v2305_v59 }
 0xc96   : > { %v982_v40 = vpop.f32.mrf.mxu0 }
 0xc97   : > { %v987_v41 = vsel %vm256_vm0, %v986_v39, -inf }
 0xc98   : > { %988 = vmax.xlane.f32.xlu1 %v987_v41  ;;  %v1735_v4 = vpop.f32.mrf.mxu0 }
 0xd21   : > { %v989_v42 = vpop.xlane.xlu1 %988 }
 0xd22   : > { %v990_v45 = vsub.f32 %v986_v39, %v989_v42  ;;  %v1904_v42 = vld [vmem:[#allocation5 + $0xe0] sm:$0xff]  }
 0xd24   : > { %v991_v46 = vmul.f32 1.442695, %v990_v45 }
 0xd26   : > { %1915 = vpow2.f32 %v991_v46 }
 0xd33   : > { %v1916_v5 = vpop.eup %1915 }
 0xd34   : > { %1745 = vmatmul.mubr.msk.f32.vlgmr.msra.gmra.mxu0 %vm256_vm0, %v1916_v5 }
 0xd35   : > { %1759 = vmatprep.mubr.msk.bf16.mxu0 %vm2079_vm1, %v2078_v8  ;;  %1756 = vmatpush3.bf16.msra.mxu0 %v1891_v6 }
 0xd36   : > { %1757 = vmatprep.subr.bf16.mxu0 %v2078_v8 }
 0xd39   : > { %1758 = vmatpush3.bf16.msra.mxu0 %v1892_v51 }
 0xd3a   : > { %1771 = vmatprep.subr.bf16.mxu0 %v2078_v8 }
 0xdf4   : > { %v1062_v59 = vpop.f32.mrf.mxu0 }
 0xdf5   : > { %1917 = vrcp.f32 %v1062_v59 }
 0xdf6   : > { %v1746_v47 = vpop.f32.mrf.mxu0 }
 0xe02   : > { %v1918_v48 = vpop.eup %1917 }
 0xe03   : > { %v1067_v49 = vmul.f32 %v1918_v48, %v1916_v5  ;;  %v226_v48 = vld [vmem:[#allocation7 + $0x58] sm:$0xff] }
 0xe05   : > { %v1068_v50 = vpack.c.bf16 %v1067_v49, %v1067_v49  ;;  %v1369_v49 = vrot.slane %v226_v48, %v2257_v19 }
 0xe07   : > { %1752 = vmatmul.mubr.msk.bf16.vlgmr.msra.gmra.mxu1 %vm256_vm0, %v1068_v50 }
 0xe08   : > { %1767 = vmatprep.mubr.msk.bf16.mxu1 %vm2079_vm1, %v2078_v8  ;;  %1764 = vmatpush3.bf16.msra.mxu1 %v1893_v38 }
 0xe09   : > { %1765 = vmatprep.subr.bf16.mxu1 %v2078_v8 }
 0xec7   : > { %v1114_v52 = vpop.f32.mrf.mxu1 }
 0xec8   : > { %v1120_v20 = vpack.c.bf16 %v1114_v52, %v1114_v52 }
 0xec9   : > { %v1753_v43 = vpop.f32.mrf.mxu1 }
 0xeca   : > { %1760 = vmatmul.mubr.msk.bf16.vlgmr.msra.gmra.mxu0 %vm256_vm0, %v1120_v20 }
 0xecb   : > { %v1117_v0 = vpop.f32.mrf.mxu1  ;;  %1787 = vmatprep.mubr.msk.bf16.mxu0 %vm2079_vm1, %v2078_v8  ;;  %1772 = vmatpush3.bf16.msra.mxu0 %v1895_v13 }
 0xecc   : > { %1773 = vmatprep.subr.bf16.mxu0 %v2078_v8 }
 0xecd   : > { %v1754_v53 = vpop.f32.mrf.mxu1 }
 0xecf   : > { %1774 = vmatpush3.bf16.msra.mxu0 %v1896_v21 }
 0xed0   : > { %1775 = vmatprep.subr.bf16.mxu0 %v2078_v8 }
 0xed3   : > { %1776 = vmatpush3.bf16.msra.mxu0 %v1897_v14 }
 0xed4   : > { %1777 = vmatprep.subr.bf16.mxu0 %v2078_v8 }
 0xed7   : > { %1778 = vmatpush3.bf16.msra.mxu0 %v1898_v15 }
 0xed8   : > { %1779 = vmatprep.subr.bf16.mxu0 %v2078_v8 }
 0xedb   : > { %1780 = vmatpush3.bf16.msra.mxu0 %v1899_v17 }
 0xedc   : > { %1781 = vmatprep.subr.bf16.mxu0 %v2078_v8 }
 0xedf   : > { %1782 = vmatpush3.bf16.msra.mxu0 %v1900_v22 }
 0xee0   : > { %1783 = vmatprep.subr.bf16.mxu0 %v2078_v8 }
 0xee3   : > { %1784 = vmatpush3.bf16.msra.mxu0 %v1901_v34 }
 0xee4   : > { %1785 = vmatprep.subr.bf16.mxu0 %v2078_v8 }
 0xee7   : > { %1786 = vmatpush3.bf16.msra.mxu0 %v1902_v37 }
 0xf8a   : > { %v1170_v56 = vpop.f32.mrf.mxu0 }
 0xf8b   : > { %v1176_v57 = vadd.f32 %v1170_v56, %v2381_v44  ;;  %v1894_v44 = vld [vmem:[#allocation5 + $0x90] sm:$0xff]  }
 0xf8c   : > { %v1761_v58 = vpop.f32.mrf.mxu0  ;;  %1766 = vmatpush3.bf16.msra.mxu1 %v1894_v44 }
 0xf8d   : > { %v2445_v60 = vadd.f32 %v1180_v54, %v1176_v57  ;;  %1791 = vmatprep.subr.bf16.mxu1 %v2078_v8 }
 0xf8e   : > { %v1173_v61 = vpop.f32.mrf.mxu0 }
 0xf8f   : > { %v1182_v62 = vsel %vm256_vm0, %v2445_v60, 0.0 }
 0xf90   : > { %1183 = vadd.xlane.f32.xlu0 %v1182_v62  ;;  %v1762_v2 = vpop.f32.mrf.mxu0 }
0x1019   : > { %v1184_v7 = vpop.xlane.xlu0 %1183 }
0x101a   : > { %v1185_v9 = vmul.f32 0.03125, %v1184_v7 }
0x101c   : > { %v1186_v10 = vsub.f32 %v2445_v60, %v1185_v9 }
0x101e   : > { %v1187_v11 = vmul.f32 %v1186_v10, %v1186_v10 }
0x1020   : > { %v1188_v12 = vsel %vm256_vm0, %v1187_v11, 0.0 }
0x1021   : > { %1189 = vadd.xlane.f32.xlu1 %v1188_v12 }
0x10aa   : > { %v1190_v23 = vpop.xlane.xlu1 %1189 }
0x10ab   : > { %v1191_v31 = vmul.f32 0.03125, %v1190_v23 }
0x10ad   : > { %v1192_v33 = vadd.f32 1e-05, %v1191_v31 }
0x10af   : > { %1919 = vrsqrt.f32 %v1192_v33 }
0x10bc   : > { %v1920_v35 = vpop.eup %1919 }
0x10bd   : > { %v1194_v24 = vmul.f32 %v1920_v35, %v1186_v10 }
0x10bf   : > { %v1199_v32 = vmul.f32 %v1198_v29, %v1194_v24 }
0x10c1   : > { %v1204_v25 = vadd.f32 %v1203_v30, %v1199_v32 }
0x10c3   : > { %v1205_v26 = vpack.c.bf16 %v1204_v25, %v1204_v25 }
0x10c5   : > { %1768 = vmatmul.mubr.msk.bf16.vlgmr.msra.gmra.mxu1 %vm256_vm0, %v1205_v26 }
0x10c6   : > { %1795 = vmatprep.mubr.msk.bf16.mxu1 %vm2079_vm1, %v2078_v8  ;;  %1792 = vmatpush3.bf16.msra.mxu1 %v1903_v63 }
0x10c7   : > { %1793 = vmatprep.subr.bf16.mxu1 %v2078_v8  ;;  %v1359_v8 = vrot.slane %v2389_v55, %v806_v36 }
0x10ca   : > { %1794 = vmatpush3.bf16.msra.mxu1 %v1904_v42 }
0x1185   : > { %v1259_v27 = vpop.f32.mrf.mxu1 }
0x1186   : > { %v1260_v28 = vadd.f32 %v1259_v27, %v1209_v1 }
0x1187   : > { %v1769_v3 = vpop.f32.mrf.mxu1 }
0x1188   : > { %v1265_v39 = vmax.f32 %v1260_v28, 0.0 }
0x1189   : > { %v1262_v40 = vpop.f32.mrf.mxu1 }
0x118a   : > { %v1266_v41 = vpack.c.bf16 %v1265_v39, %v1265_v39 }
0x118b   : > { %v1770_v4 = vpop.f32.mrf.mxu1 }
0x118c   : > { %1788 = vmatmul.mubr.bf16.vlgmr.msra.gmra.mxu0 %v1266_v41 }
0x124c   : > { %v1349_v45 = vpop.f32.mrf.mxu0 }
0x124d   : > { %v1355_v46 = vadd.f32 %v1349_v45, %v2445_v60 }
0x124e   : > { %v1789_v16 = vpop.f32.mrf.mxu0 }
0x124f   : > { %v1360_v5 = vadd.f32 %v1359_v8, %v1355_v46 }
0x1250   : > { %v1352_v6 = vpop.f32.mrf.mxu0 }
0x1251   : > { %v1365_v59 = vpack.c.bf16 %v1360_v5, %v1360_v5 }
0x1252   : > { %v1790_v47 = vpop.f32.mrf.mxu0 }
0x1253   : > { %1796 = vmatmul.mubr.msk.bf16.vlgmr.msra.gmra.mxu1 %vm256_vm0, %v1365_v59 }
0x1313   : > { %v1419_v18 = vpop.f32.mrf.mxu1 }
0x1314   : > { %v1420_v36 = vadd.f32 %v1419_v18, %v1369_v49 }
0x1315   : > { %v1797_v55 = vpop.f32.mrf.mxu1 }
0x1316   : > { %1425 = vst [vmem:[%s214_s30] sm:$0xff] %v1420_v36 }
0x1317   : > { %v1422_v50 = vpop.f32.mrf.mxu1 }
0x1318   : > { %2014 = shalt.err (!%p2011_p9)
}
0x1319   : > { %s2015_s25 = scalar_lea.hbm %s2485_s10, 128  ;;  %s2019_s5 = scalar_lea.hbm %s2531_s3, 256 }
0x131a   : > { %p2016_p13 = scmp.ne.s32.totalorder %s2485_s10, %s2015_s25  ;;  %p2020_p4 = scmp.lt.s32.totalorder %s2485_s10, %s2531_s3 }
0x131b   : > { %p2021_p8 = scmp.lt.s32.totalorder %s2019_s5, %s2015_s25 }
0x131c   : > { %p2017_p5 = pnand %p2016_p13, %p2547_p0 }
0x131d   : > { %p2022_p7 = por %p2021_p8, %p2020_p4 }
0x131e   : > { %p2018_p10 = pneg %p2017_p5 }
0x1320   : > { %p2023_p11 = pnand %p2022_p7, %p2018_p10 }
0x1322   : > { %2026 = shalt.err (!%p2023_p11)
}
0x1323   : > { %1809 = dma.vmem_to_hbm [thread:$0]  (%p2547_p0), %s2487_s4, 128, %s2485_s10, %s1427_s11   ;;  %v1798_v19 = vpop.f32.mrf.mxu1 }
0x1324 PF: > { %s1452_s20 = sand.u32 1, %s2057_s12   ;;  %p2548_p1 = scmp.ne.s32.totalorder %s2537_s19, 0 }
0x1325   : > { %p2549_p2 = scmp.ge.s32.totalorder %s2069_s15, 2  ;;  %s1453_s27 = scalar_lea.sflag [#allocation4], %s1452_s20 }
0x1327   : > { %p1823_p6 = pnand %p2549_p2, %p2548_p1 }
0x1329   : > { %p1824_p12 = pneg %p1823_p6 }
0x132b   : > { %2052 = dma.done.wait (%p1824_p12), %s1453_s27, 128  }
0x132c   : > { %2054 = vsyncadd (%p1824_p12), %s1453_s27, 4294967168  ;;  %p17_p3 = scmp.ge.s32.totalorder %s2176_s9, 4   ;;  %s2550_s12 = smov %s2061_s13 }
0x132d   : > { %s2551_s13 = smov %s2065_s14  ;;  %s2552_s14 = smov %s2185_s17 }
0x132e   : > { %s2553_s15 = smov %s2176_s9  ;;  %19 = sbr.rel (!%p17_p3) target bundleno = 6 (0x6), region = 85 }
0x1333   :  { %1458 = vsyncpa [#allocation3], 1 }
0x1334   :  { %1460 = vsyncpa [#allocation3 + $0x1], 1 }
0x1335   :  { %1461 = vsyncpa [#allocation6], 1 }
0x1336   :  { %1462 = vsyncpa [#allocation4], 1 }
0x1337   :  { %1464 = vsyncpa [#allocation4 + $0x1], 1 }

</bundles_post_ra>
